<compile_context>
chip_gen: v7x
topology: tpu7x:2x2x1
jax: 0.10.0
libtpu: 0.0.40
codegen_flags: <defaults>
</compile_context>

<pallas_src>
import numpy as np
import jax
import jax.numpy as jnp
from jax.experimental import pallas as pl
from jax.experimental.pallas import tpu as pltpu

# ----------------------------- configuration -------------------------------
B = 2              # batch
C_IN = 3           # in_chans (PatchEmbed default)
H_Z = W_Z = 8      # template spatial
H_X = W_X = 16     # search spatial
PATCH = 4          # patch size (small-shape stand-in for 16)
EMBED = 32         # embed_dim (small-shape stand-in for 384)
NUM_HEADS = 4
HEAD_DIM = EMBED // NUM_HEADS
DEPTH = 2
MLP_HIDDEN = 4 * EMBED
LN_EPS = 1e-6

L_Z = (H_Z // PATCH) * (W_Z // PATCH)   # 4  template tokens
L_X = (H_X // PATCH) * (W_X // PATCH)   # 16 search tokens
L = L_Z + L_X                           # 20 combined tokens ('direct' cat)
P_IN = C_IN * PATCH * PATCH             # 48 im2col feature width
SCALE = HEAD_DIM ** -0.5

assert NUM_HEADS * HEAD_DIM == EMBED    # heads = contiguous, disjoint lane ranges

# Q@K^T without an explicit transpose: contract dim 1 of both operands.
TRANS_B_DIM_NUMBERS = (((1,), (1,)), ((), ()))


def _layernorm(v, g, b):
    mu = jnp.mean(v, axis=-1, keepdims=True)
    var = jnp.mean((v - mu) ** 2, axis=-1, keepdims=True)
    return (v - mu) * jax.lax.rsqrt(var + LN_EPS) * g + b


# --------------------------- fused Pallas kernel ----------------------------
def fused_backbone_kernel(patches_ref, pw_ref, posb_ref, hm_ref,
                          ln1g_ref, ln1b_ref,
                          wq_ref, bq_ref, wk_ref, bk_ref, wv_ref, bv_ref,
                          wo_ref, bo_ref,
                          ln2g_ref, ln2b_ref,
                          wfc1_ref, bfc1_ref, wfc2_ref, bfc2_ref,
                          ng_ref, nb_ref,
                          out_ref, x_scratch):
    """One grid step = (one batch element b, one transformer block d)."""
    bf16, f32 = jnp.bfloat16, jnp.float32
    d = pl.program_id(1)
    n_d = pl.num_programs(1)

    # ---- patch embed (conv-as-matmul) + (pos + temporal-pos + conv-bias) add ----
    # Runs only on the first depth step of this batch tile; result seeds the
    # VMEM-resident residual stream in x_scratch.
    @pl.when(d == 0)
    def _():
        x0 = jnp.dot(patches_ref[...], pw_ref[...], preferred_element_type=f32)
        x_scratch[...] = x0 + posb_ref[...]

    x = x_scratch[...]          # (L, E) f32 residual stream
    hm = hm_ref[...]            # (NH, 1, E) f32 {0,1} per-head lane mask

    # ------------------------------ MHSA ------------------------------------
    xn = _layernorm(x, ln1g_ref[...], ln1b_ref[...])
    xn16 = xn.astype(bf16)
    q = jnp.dot(xn16, wq_ref[...], preferred_element_type=f32) + bq_ref[...]
    k = jnp.dot(xn16, wk_ref[...], preferred_element_type=f32) + bk_ref[...]
    v = jnp.dot(xn16, wv_ref[...], preferred_element_type=f32) + bv_ref[...]

    # Head-lane-mask trick: Q and V are masked per head (zeros outside that head's
    # contiguous lane range); K is intentionally left unmasked (masking Q alone makes
    # each score a per-head contraction).  Summing the per-head outputs over h then
    # reconstructs the concat layout because heads occupy disjoint lanes.  Masking is
    # done in f32 (v5e has no bf16 VPU), bf16 only at the MXU operands.
    qh = (q[None, :, :] * hm).astype(bf16)      # (NH, L, E)
    vh = (v[None, :, :] * hm).astype(bf16)      # (NH, L, E)
    k16 = k.astype(bf16)                        # (L, E)  -> single RHS push to MXU

    s = jax.lax.dot_general(qh.reshape(NUM_HEADS * L, EMBED), k16,
                            TRANS_B_DIM_NUMBERS,
                            preferred_element_type=f32)
    s = s.reshape(NUM_HEADS, L, L) * SCALE      # (NH, L, L), batch == grid axis -> no batch mask
    s = s - jnp.max(s, axis=-1, keepdims=True)
    p = jnp.exp(s)
    p = p * pl.reciprocal(jnp.sum(p, axis=-1, keepdims=True), approx=True)

    o = jnp.einsum('hqk,hke->hqe', p.astype(bf16), vh,
                   preferred_element_type=f32)  # (NH, L, E)
    attn = jnp.sum(o, axis=0)                   # disjoint head lanes -> sum == concat
    x = x + jnp.dot(attn.astype(bf16), wo_ref[...],
                    preferred_element_type=f32) + bo_ref[...]

    # ------------------------------ MLP --------------------------------------
    xn2 = _layernorm(x, ln2g_ref[...], ln2b_ref[...]).astype(bf16)
    h1 = jnp.dot(xn2, wfc1_ref[...], preferred_element_type=f32) + bfc1_ref[...]
    h1 = jax.nn.gelu(h1, approximate=True)
    x = x + jnp.dot(h1.astype(bf16), wfc2_ref[...],
                    preferred_element_type=f32) + bfc2_ref[...]

    x_scratch[...] = x                          # carry residual stream to next depth step

    # ---- final LayerNorm + output store only after the last block ----
    @pl.when(d == n_d - 1)
    def _():
        out_ref[...] = _layernorm(x, ng_ref[...], nb_ref[...])


# ------------------------------ glue (plain JAX) ----------------------------
def extract_patches(img, P):
    # img: [B, C, H, W] (NCHW) -> [B, L, C*P*P], L row-major over the patch grid.
    Bn, C, H, W = img.shape
    hp, wp = H // P, W // P
    x = img.reshape(Bn, C, hp, P, wp, P)
    x = x.transpose(0, 2, 4, 1, 3, 5)          # [B, hp, wp, C, P, P]
    return x.reshape(Bn, hp * wp, C * P * P)


def _head_mask():
    # (NH, 1, E) f32 one-hot lane mask per head (contiguous head_dim lane ranges).
    ids = np.arange(EMBED) // HEAD_DIM
    m = (ids[None, :] == np.arange(NUM_HEADS)[:, None]).astype(np.float32)
    return jnp.asarray(m.reshape(NUM_HEADS, 1, EMBED))


def init_params(key):
    keys = jax.random.split(key, 8 + DEPTH)

    def nrm(k, shape, std=0.02):
        return (std * jax.random.normal(k, shape)).astype(jnp.float32)

    params = {
        # conv weight [E, C, P, P] flattened to [C*P*P, E] (matmul form)
        "patch_w": nrm(keys[0], (P_IN, EMBED)),
        "patch_b": jnp.zeros((1, EMBED), jnp.float32),
        "pos_z": nrm(keys[1], (1, L_Z, EMBED)),
        "pos_x": nrm(keys[2], (1, L_X, EMBED)),
        "tpos_z": nrm(keys[3], (1, L_Z, EMBED)),     # temporal_pos_embed_z
        "tpos_x": nrm(keys[4], (1, L_X, EMBED)),     # temporal_pos_embed_x
        "norm_g": jnp.ones((1, EMBED), jnp.float32),
        "norm_b": jnp.zeros((1, EMBED), jnp.float32),
        "blocks": [],
    }
    for d in range(DEPTH):
        bk = jax.random.split(keys[8 + d], 4)
        params["blocks"].append({
            "ln1_g": jnp.ones((1, EMBED), jnp.float32),
            "ln1_b": jnp.zeros((1, EMBED), jnp.float32),
            "w_qkv": nrm(bk[0], (EMBED, 3 * EMBED)),
            "b_qkv": jnp.zeros((1, 3 * EMBED), jnp.float32),
            "w_proj": nrm(bk[1], (EMBED, EMBED)),
            "b_proj": jnp.zeros((1, EMBED), jnp.float32),
            "ln2_g": jnp.ones((1, EMBED), jnp.float32),
            "ln2_b": jnp.zeros((1, EMBED), jnp.float32),
            "w_fc1": nrm(bk[2], (EMBED, MLP_HIDDEN)),
            "b_fc1": jnp.zeros((1, MLP_HIDDEN), jnp.float32),
            "w_fc2": nrm(bk[3], (MLP_HIDDEN, EMBED)),
            "b_fc2": jnp.zeros((1, EMBED), jnp.float32),
        })
    return params


def base_backbone_forward(z, x, params):
    """z: [B, C, H_z, W_z], x: [B, C, H_x, W_x] -> ([B, L_z+L_x, E], aux_dict)."""
    bf16 = jnp.bfloat16

    pz = extract_patches(z, PATCH)                                   # [B, L_Z, P_IN]
    px = extract_patches(x, PATCH)                                   # [B, L_X, P_IN]
    # combine_tokens 'direct' = template tokens first, then search tokens.
    patches = jnp.concatenate([pz, px], axis=1).astype(bf16)         # (B, L, P_IN) bf16
    pos = jnp.concatenate([params["pos_z"] + params["tpos_z"],
                           params["pos_x"] + params["tpos_x"]], axis=1)[0]   # (L, E)
    pos_bias = pos + params["patch_b"]     # fold patch-conv bias into the pos add (exact)

    stack = lambda name: jnp.stack([blk[name] for blk in params["blocks"]], axis=0)

    # Split fused QKV weights host-side -> kernel never slices sub-128 lane columns.
    wqkv = stack("w_qkv")                                            # (D, E, 3E)
    bqkv = stack("b_qkv")                                            # (D, 1, 3E)
    w_q = wqkv[:, :, 0 * EMBED:1 * EMBED].astype(bf16)
    w_k = wqkv[:, :, 1 * EMBED:2 * EMBED].astype(bf16)
    w_v = wqkv[:, :, 2 * EMBED:3 * EMBED].astype(bf16)
    b_q = bqkv[:, :, 0 * EMBED:1 * EMBED]
    b_k = bqkv[:, :, 1 * EMBED:2 * EMBED]
    b_v = bqkv[:, :, 2 * EMBED:3 * EMBED]

    # BlockSpec helpers: squeeze the leading batch / depth axis out of the kernel refs.
    per_b = lambda s: pl.BlockSpec((None,) + s, lambda b, d: (b,) + (0,) * len(s))
    per_d = lambda s: pl.BlockSpec((None,) + s, lambda b, d: (d,) + (0,) * len(s))
    shared = lambda s: pl.BlockSpec(s, lambda b, d: (0,) * len(s))

    in_specs = [
        per_b((L, P_IN)),                              # patches
        shared((P_IN, EMBED)),                         # patch_w
        shared((L, EMBED)),                            # pos_bias
        shared((NUM_HEADS, 1, EMBED)),                 # head lane mask
        per_d((1, EMBED)), per_d((1, EMBED)),          # ln1 g, b
        per_d((EMBED, EMBED)), per_d((1, EMBED)),      # w_q, b_q
        per_d((EMBED, EMBED)), per_d((1, EMBED)),      # w_k, b_k
        per_d((EMBED, EMBED)), per_d((1, EMBED)),      # w_v, b_v
        per_d((EMBED, EMBED)), per_d((1, EMBED)),      # w_proj, b_proj
        per_d((1, EMBED)), per_d((1, EMBED)),          # ln2 g, b
        per_d((EMBED, MLP_HIDDEN)), per_d((1, MLP_HIDDEN)),   # w_fc1, b_fc1
        per_d((MLP_HIDDEN, EMBED)), per_d((1, EMBED)),        # w_fc2, b_fc2
        shared((1, EMBED)), shared((1, EMBED)),        # final norm g, b
    ]

    out = pl.pallas_call(
        fused_backbone_kernel,
        out_shape=jax.ShapeDtypeStruct((B, L, EMBED), jnp.float32),
        grid_spec=pltpu.PrefetchScalarGridSpec(
            num_scalar_prefetch=0,
            grid=(B, DEPTH),                           # batch parallel, depth arbitrary
            in_specs=in_specs,
            # Output block index constant across depth -> VMEM-resident per batch,
            # written back to HBM once after the last block.
            out_specs=pl.BlockSpec((None, L, EMBED), lambda b, d: (b, 0, 0)),
            scratch_shapes=[pltpu.VMEM((L, EMBED), jnp.float32)],   # residual stream
        ),
        compiler_params=pltpu.CompilerParams(
            dimension_semantics=("parallel", "arbitrary"),
            # Toy working set is tiny; at OSTrack scale on v5e/v6e raise
            # vmem_limit_bytes here if keeping more resident (not on v7x, 64 MiB).
        ),
    )(patches, params["patch_w"].astype(bf16), pos_bias, _head_mask(),
      stack("ln1_g"), stack("ln1_b"),
      w_q, b_q, w_k, b_k, w_v, b_v,
      stack("w_proj").astype(bf16), stack("b_proj"),
      stack("ln2_g"), stack("ln2_b"),
      stack("w_fc1").astype(bf16), stack("b_fc1"),
      stack("w_fc2").astype(bf16), stack("b_fc2"),
      params["norm_g"], params["norm_b"])

    # pos_drop: dropout(p=0) at inference -> identity.
    # recover_tokens(..., mode='direct') is identity.
    return out, {"attn": None}
    # TODO(synk): finetune_track (bicubic pos-embed interpolation) is init-time
    # configuration, not part of forward(); not replicated here.


# ------------------------------ pure-JAX reference --------------------------
def reference_forward(z, x, params):
    """Standard per-head MHSA formulation, bf16 MXU operands / f32 accumulate."""
    bf16, f32 = jnp.bfloat16, jnp.float32

    def mm(a, w):
        return jnp.dot(a.astype(bf16), w.astype(bf16), preferred_element_type=f32)

    pz = extract_patches(z, PATCH)
    px = extract_patches(x, PATCH)
    patches = jnp.concatenate([pz, px], axis=1)                      # (B, L, P_IN)
    pos = jnp.concatenate([params["pos_z"] + params["tpos_z"],
                           params["pos_x"] + params["tpos_x"]], axis=1)
    t = mm(patches, params["patch_w"]) + params["patch_b"] + pos
    for blk in params["blocks"]:
        xn = _layernorm(t, blk["ln1_g"], blk["ln1_b"])
        qkv = mm(xn, blk["w_qkv"]) + blk["b_qkv"]
        q, k, v = qkv[..., :EMBED], qkv[..., EMBED:2 * EMBED], qkv[..., 2 * EMBED:]
        q = q.reshape(B, L, NUM_HEADS, HEAD_DIM).transpose(0, 2, 1, 3).astype(bf16)
        k = k.reshape(B, L, NUM_HEADS, HEAD_DIM).transpose(0, 2, 1, 3).astype(bf16)
        v = v.reshape(B, L, NUM_HEADS, HEAD_DIM).transpose(0, 2, 1, 3).astype(bf16)
        s = jnp.einsum("bhqd,bhkd->bhqk", q, k, preferred_element_type=f32) * SCALE
        s = s - jnp.max(s, axis=-1, keepdims=True)
        p = jnp.exp(s)
        p = p / jnp.sum(p, axis=-1, keepdims=True)
        o = jnp.einsum("bhqk,bhkd->bhqd", p.astype(bf16), v, preferred_element_type=f32)
        o = o.transpose(0, 2, 1, 3).reshape(B, L, EMBED)
        t = t + mm(o, blk["w_proj"]) + blk["b_proj"]
        xn2 = _layernorm(t, blk["ln2_g"], blk["ln2_b"])
        h1 = jax.nn.gelu(mm(xn2, blk["w_fc1"]) + blk["b_fc1"], approximate=True)
        t = t + mm(h1, blk["w_fc2"]) + blk["b_fc2"]
    return _layernorm(t, params["norm_g"], params["norm_b"]), {"attn": None}


# ------------------------------ main ----------------------------------------
if __name__ == "__main__":
    key = jax.random.PRNGKey(0)
    kz, kx, kp = jax.random.split(key, 3)
    z = jax.random.normal(kz, (B, C_IN, H_Z, W_Z), dtype=jnp.float32)   # template NCHW
    x = jax.random.normal(kx, (B, C_IN, H_X, W_X), dtype=jnp.float32)   # search   NCHW
    params = init_params(kp)

    out, aux = base_backbone_forward(z, x, params)
    out = jax.block_until_ready(out)

    ref, _ = reference_forward(z, x, params)
    assert out.shape == (B, L_Z + L_X, EMBED)
    assert aux["attn"] is None
    # Tolerance covers the approx-reciprocal softmax and bf16 accumulation-order
    # differences between the lane-mask formulation and the per-head reference.
    # Note: approximate (tanh) GELU is used in both kernel and reference; PyTorch/timm
    # default is exact erf GELU.
    np.testing.assert_allclose(np.asarray(out), np.asarray(ref), rtol=5e-3, atol=5e-3)
    print("KERNEL_OK")
</pallas_src>

<mosaic_0001>
module attributes {stable_mosaic.version = 11 : i64} {
  func.func @fused_backbone_kernel(%arg0: i32, %arg1: i32, %arg2: memref<1x20x48xbf16, #tpu.memory_space<vmem>>, %arg3: memref<48x32xbf16, #tpu.memory_space<vmem>>, %arg4: memref<20x32xf32, #tpu.memory_space<vmem>>, %arg5: memref<4x1x32xf32, #tpu.memory_space<vmem>>, %arg6: memref<1x1x32xf32, #tpu.memory_space<vmem>>, %arg7: memref<1x1x32xf32, #tpu.memory_space<vmem>>, %arg8: memref<1x32x32xbf16, #tpu.memory_space<vmem>>, %arg9: memref<1x1x32xf32, #tpu.memory_space<vmem>>, %arg10: memref<1x32x32xbf16, #tpu.memory_space<vmem>>, %arg11: memref<1x1x32xf32, #tpu.memory_space<vmem>>, %arg12: memref<1x32x32xbf16, #tpu.memory_space<vmem>>, %arg13: memref<1x1x32xf32, #tpu.memory_space<vmem>>, %arg14: memref<1x32x32xbf16, #tpu.memory_space<vmem>>, %arg15: memref<1x1x32xf32, #tpu.memory_space<vmem>>, %arg16: memref<1x1x32xf32, #tpu.memory_space<vmem>>, %arg17: memref<1x1x32xf32, #tpu.memory_space<vmem>>, %arg18: memref<1x32x128xbf16, #tpu.memory_space<vmem>>, %arg19: memref<1x1x128xf32, #tpu.memory_space<vmem>>, %arg20: memref<1x128x32xbf16, #tpu.memory_space<vmem>>, %arg21: memref<1x1x32xf32, #tpu.memory_space<vmem>>, %arg22: memref<1x32xf32, #tpu.memory_space<vmem>>, %arg23: memref<1x32xf32, #tpu.memory_space<vmem>>, %arg24: memref<1x20x32xf32, #tpu.memory_space<vmem>>, %arg25: memref<20x32xf32, #tpu.memory_space<vmem>>) attributes {dimension_semantics = [#tpu.dimension_semantics<parallel>, #tpu.dimension_semantics<arbitrary>], iteration_bounds = array<i64: 2, 2>, scalar_prefetch = 0 : i64, scratch_operands = 1 : i64, tpu.core_type = #tpu.core_type<tc>, window_params = [{transform_indices = @transform_0, window_bounds = array<i64: 1, 20, 48>}, {pipeline_mode = #tpu.pipeline_mode<synchronous>, transform_indices = @transform_1, window_bounds = array<i64: 48, 32>}, {pipeline_mode = #tpu.pipeline_mode<synchronous>, transform_indices = @transform_2, window_bounds = array<i64: 20, 32>}, {pipeline_mode = #tpu.pipeline_mode<synchronous>, transform_indices = @transform_3, window_bounds = array<i64: 4, 1, 32>}, {transform_indices = @transform_4, window_bounds = array<i64: 1, 1, 32>}, {transform_indices = @transform_5, window_bounds = array<i64: 1, 1, 32>}, {transform_indices = @transform_6, window_bounds = array<i64: 1, 32, 32>}, {transform_indices = @transform_7, window_bounds = array<i64: 1, 1, 32>}, {transform_indices = @transform_8, window_bounds = array<i64: 1, 32, 32>}, {transform_indices = @transform_9, window_bounds = array<i64: 1, 1, 32>}, {transform_indices = @transform_10, window_bounds = array<i64: 1, 32, 32>}, {transform_indices = @transform_11, window_bounds = array<i64: 1, 1, 32>}, {transform_indices = @transform_12, window_bounds = array<i64: 1, 32, 32>}, {transform_indices = @transform_13, window_bounds = array<i64: 1, 1, 32>}, {transform_indices = @transform_14, window_bounds = array<i64: 1, 1, 32>}, {transform_indices = @transform_15, window_bounds = array<i64: 1, 1, 32>}, {transform_indices = @transform_16, window_bounds = array<i64: 1, 32, 128>}, {transform_indices = @transform_17, window_bounds = array<i64: 1, 1, 128>}, {transform_indices = @transform_18, window_bounds = array<i64: 1, 128, 32>}, {transform_indices = @transform_19, window_bounds = array<i64: 1, 1, 32>}, {pipeline_mode = #tpu.pipeline_mode<synchronous>, transform_indices = @transform_20, window_bounds = array<i64: 1, 32>}, {pipeline_mode = #tpu.pipeline_mode<synchronous>, transform_indices = @transform_21, window_bounds = array<i64: 1, 32>}, {transform_indices = @transform_22, window_bounds = array<i64: 1, 20, 32>}]} {
    %c0_i32 = arith.constant 0 : i32
    %0 = arith.cmpi eq, %arg1, %c0_i32 : i32
    %1 = arith.extui %0 : i1 to i32
    %c0_i32_0 = arith.constant 0 : i32
    %2 = arith.cmpi ne, %1, %c0_i32_0 : i32
    scf.if %2 {
      %c0_81 = arith.constant 0 : index
      %c0_82 = arith.constant 0 : index
      %c0_83 = arith.constant 0 : index
      %151 = vector.load %arg2[%c0_81, %c0_82, %c0_83] : memref<1x20x48xbf16, #tpu.memory_space<vmem>>, vector<1x20x48xbf16>
      %152 = vector.shape_cast %151 : vector<1x20x48xbf16> to vector<20x48xbf16>
      %c0_84 = arith.constant 0 : index
      %c0_85 = arith.constant 0 : index
      %153 = vector.load %arg3[%c0_84, %c0_85] : memref<48x32xbf16, #tpu.memory_space<vmem>>, vector<48x32xbf16>
      %cst_86 = arith.constant dense<0.000000e+00> : vector<20x32xf32>
      %154 = tpu.matmul %152, %153, %cst_86 {dimension_numbers = #tpu.dot_dimension_numbers<[1], [0], [0], [1], [0, 0, 1, 1], [], []>} : vector<20x48xbf16>, vector<48x32xbf16>, vector<20x32xf32> -> vector<20x32xf32>
      %c0_87 = arith.constant 0 : index
      %c0_88 = arith.constant 0 : index
      %155 = vector.load %arg4[%c0_87, %c0_88] : memref<20x32xf32, #tpu.memory_space<vmem>>, vector<20x32xf32>
      %156 = arith.addf %154, %155 : vector<20x32xf32>
      %c0_89 = arith.constant 0 : index
      %c0_90 = arith.constant 0 : index
      %157 = vector.load %arg25[%c0_89, %c0_90] : memref<20x32xf32, #tpu.memory_space<vmem>>, vector<20x32xf32>
      tpu.vector_store %arg25[%c0_89, %c0_90], %156 {strides = array<i32>} : memref<20x32xf32, #tpu.memory_space<vmem>>, vector<20x32xf32>,
    } else {
    }
    %c0 = arith.constant 0 : index
    %c0_1 = arith.constant 0 : index
    %3 = vector.load %arg25[%c0, %c0_1] : memref<20x32xf32, #tpu.memory_space<vmem>>, vector<20x32xf32>
    %c0_2 = arith.constant 0 : index
    %c0_3 = arith.constant 0 : index
    %c0_4 = arith.constant 0 : index
    %4 = vector.load %arg5[%c0_2, %c0_3, %c0_4] : memref<4x1x32xf32, #tpu.memory_space<vmem>>, vector<4x1x32xf32>
    %c0_5 = arith.constant 0 : index
    %c0_6 = arith.constant 0 : index
    %c0_7 = arith.constant 0 : index
    %5 = vector.load %arg6[%c0_5, %c0_6, %c0_7] : memref<1x1x32xf32, #tpu.memory_space<vmem>>, vector<1x1x32xf32>
    %6 = vector.shape_cast %5 : vector<1x1x32xf32> to vector<1x32xf32>
    %c0_8 = arith.constant 0 : index
    %c0_9 = arith.constant 0 : index
    %c0_10 = arith.constant 0 : index
    %7 = vector.load %arg7[%c0_8, %c0_9, %c0_10] : memref<1x1x32xf32, #tpu.memory_space<vmem>>, vector<1x1x32xf32>
    %8 = vector.shape_cast %7 : vector<1x1x32xf32> to vector<1x32xf32>
    %cst = arith.constant dense<0.000000e+00> : vector<20xf32>
    %9 = vector.multi_reduction <add>, %3, %cst [1] : vector<20x32xf32> to vector<20xf32>
    %10 = vector.shape_cast %9 : vector<20xf32> to vector<20x1xf32>
    %cst_11 = arith.constant 3.200000e+01 : f32
    %11 = vector.broadcast %cst_11 : f32 to vector<20x1xf32>
    %12 = arith.divf %10, %11 : vector<20x1xf32>
    %13 = vector.broadcast %12 : vector<20x1xf32> to vector<20x32xf32>
    %14 = arith.subf %3, %13 : vector<20x32xf32>
    %15 = arith.mulf %14, %14 : vector<20x32xf32>
    %cst_12 = arith.constant dense<0.000000e+00> : vector<20xf32>
    %16 = vector.multi_reduction <add>, %15, %cst_12 [1] : vector<20x32xf32> to vector<20xf32>
    %17 = vector.shape_cast %16 : vector<20xf32> to vector<20x1xf32>
    %cst_13 = arith.constant 3.200000e+01 : f32
    %18 = vector.broadcast %cst_13 : f32 to vector<20x1xf32>
    %19 = arith.divf %17, %18 : vector<20x1xf32>
    %20 = vector.broadcast %12 : vector<20x1xf32> to vector<20x32xf32>
    %21 = arith.subf %3, %20 : vector<20x32xf32>
    %cst_14 = arith.constant 9.99999997E-7 : f32
    %22 = vector.broadcast %cst_14 : f32 to vector<20x1xf32>
    %23 = arith.addf %19, %22 : vector<20x1xf32>
    %24 = math.rsqrt %23 : vector<20x1xf32>
    %25 = vector.broadcast %24 : vector<20x1xf32> to vector<20x32xf32>
    %26 = arith.mulf %21, %25 : vector<20x32xf32>
    %27 = vector.broadcast %6 : vector<1x32xf32> to vector<20x32xf32>
    %28 = arith.mulf %26, %27 : vector<20x32xf32>
    %29 = vector.broadcast %8 : vector<1x32xf32> to vector<20x32xf32>
    %30 = arith.addf %28, %29 : vector<20x32xf32>
    %31 = arith.truncf %30 : vector<20x32xf32> to vector<20x32xbf16>
    %c0_15 = arith.constant 0 : index
    %c0_16 = arith.constant 0 : index
    %c0_17 = arith.constant 0 : index
    %32 = vector.load %arg8[%c0_15, %c0_16, %c0_17] : memref<1x32x32xbf16, #tpu.memory_space<vmem>>, vector<1x32x32xbf16>
    %33 = vector.shape_cast %32 : vector<1x32x32xbf16> to vector<32x32xbf16>
    %cst_18 = arith.constant dense<0.000000e+00> : vector<20x32xf32>
    %34 = tpu.matmul %31, %33, %cst_18 {dimension_numbers = #tpu.dot_dimension_numbers<[1], [0], [0], [1], [0, 0, 1, 1], [], []>} : vector<20x32xbf16>, vector<32x32xbf16>, vector<20x32xf32> -> vector<20x32xf32>
    %c0_19 = arith.constant 0 : index
    %c0_20 = arith.constant 0 : index
    %c0_21 = arith.constant 0 : index
    %35 = vector.load %arg9[%c0_19, %c0_20, %c0_21] : memref<1x1x32xf32, #tpu.memory_space<vmem>>, vector<1x1x32xf32>
    %36 = vector.shape_cast %35 : vector<1x1x32xf32> to vector<1x32xf32>
    %37 = vector.broadcast %36 : vector<1x32xf32> to vector<20x32xf32>
    %38 = arith.addf %34, %37 : vector<20x32xf32>
    %c0_22 = arith.constant 0 : index
    %c0_23 = arith.constant 0 : index
    %c0_24 = arith.constant 0 : index
    %39 = vector.load %arg10[%c0_22, %c0_23, %c0_24] : memref<1x32x32xbf16, #tpu.memory_space<vmem>>, vector<1x32x32xbf16>
    %40 = vector.shape_cast %39 : vector<1x32x32xbf16> to vector<32x32xbf16>
    %cst_25 = arith.constant dense<0.000000e+00> : vector<20x32xf32>
    %41 = tpu.matmul %31, %40, %cst_25 {dimension_numbers = #tpu.dot_dimension_numbers<[1], [0], [0], [1], [0, 0, 1, 1], [], []>} : vector<20x32xbf16>, vector<32x32xbf16>, vector<20x32xf32> -> vector<20x32xf32>
    %c0_26 = arith.constant 0 : index
    %c0_27 = arith.constant 0 : index
    %c0_28 = arith.constant 0 : index
    %42 = vector.load %arg11[%c0_26, %c0_27, %c0_28] : memref<1x1x32xf32, #tpu.memory_space<vmem>>, vector<1x1x32xf32>
    %43 = vector.shape_cast %42 : vector<1x1x32xf32> to vector<1x32xf32>
    %44 = vector.broadcast %43 : vector<1x32xf32> to vector<20x32xf32>
    %45 = arith.addf %41, %44 : vector<20x32xf32>
    %c0_29 = arith.constant 0 : index
    %c0_30 = arith.constant 0 : index
    %c0_31 = arith.constant 0 : index
    %46 = vector.load %arg12[%c0_29, %c0_30, %c0_31] : memref<1x32x32xbf16, #tpu.memory_space<vmem>>, vector<1x32x32xbf16>
    %47 = vector.shape_cast %46 : vector<1x32x32xbf16> to vector<32x32xbf16>
    %cst_32 = arith.constant dense<0.000000e+00> : vector<20x32xf32>
    %48 = tpu.matmul %31, %47, %cst_32 {dimension_numbers = #tpu.dot_dimension_numbers<[1], [0], [0], [1], [0, 0, 1, 1], [], []>} : vector<20x32xbf16>, vector<32x32xbf16>, vector<20x32xf32> -> vector<20x32xf32>
    %c0_33 = arith.constant 0 : index
    %c0_34 = arith.constant 0 : index
    %c0_35 = arith.constant 0 : index
    %49 = vector.load %arg13[%c0_33, %c0_34, %c0_35] : memref<1x1x32xf32, #tpu.memory_space<vmem>>, vector<1x1x32xf32>
    %50 = vector.shape_cast %49 : vector<1x1x32xf32> to vector<1x32xf32>
    %51 = vector.broadcast %50 : vector<1x32xf32> to vector<20x32xf32>
    %52 = arith.addf %48, %51 : vector<20x32xf32>
    %53 = vector.shape_cast %38 : vector<20x32xf32> to vector<1x20x32xf32>
    %54 = vector.broadcast %53 : vector<1x20x32xf32> to vector<4x20x32xf32>
    %55 = vector.broadcast %4 : vector<4x1x32xf32> to vector<4x20x32xf32>
    %56 = arith.mulf %54, %55 : vector<4x20x32xf32>
    %57 = arith.truncf %56 : vector<4x20x32xf32> to vector<4x20x32xbf16>
    %58 = vector.shape_cast %52 : vector<20x32xf32> to vector<1x20x32xf32>
    %59 = vector.broadcast %58 : vector<1x20x32xf32> to vector<4x20x32xf32>
    %60 = vector.broadcast %4 : vector<4x1x32xf32> to vector<4x20x32xf32>
    %61 = arith.mulf %59, %60 : vector<4x20x32xf32>
    %62 = arith.truncf %61 : vector<4x20x32xf32> to vector<4x20x32xbf16>
    %63 = arith.truncf %45 : vector<20x32xf32> to vector<20x32xbf16>
    %64 = vector.shape_cast %57 : vector<4x20x32xbf16> to vector<80x32xbf16>
    %cst_36 = arith.constant dense<0.000000e+00> : vector<80x20xf32>
    %65 = tpu.matmul %64, %63, %cst_36 {dimension_numbers = #tpu.dot_dimension_numbers<[1], [1], [0], [0], [0, 0, 1, 0], [], []>} : vector<80x32xbf16>, vector<20x32xbf16>, vector<80x20xf32> -> vector<80x20xf32>
    %66 = vector.shape_cast %65 : vector<80x20xf32> to vector<4x20x20xf32>
    %cst_37 = arith.constant 0.353553385 : f32
    %67 = vector.broadcast %cst_37 : f32 to vector<4x20x20xf32>
    %68 = arith.mulf %66, %67 : vector<4x20x20xf32>
    %cst_38 = arith.constant dense<0xFF800000> : vector<4x20xf32>
    %69 = vector.multi_reduction <maximumf>, %68, %cst_38 [2] : vector<4x20x20xf32> to vector<4x20xf32>
    %70 = vector.shape_cast %69 : vector<4x20xf32> to vector<4x20x1xf32>
    %71 = vector.broadcast %70 : vector<4x20x1xf32> to vector<4x20x20xf32>
    %72 = arith.subf %68, %71 : vector<4x20x20xf32>
    %73 = math.exp %72 : vector<4x20x20xf32>
    %cst_39 = arith.constant dense<0.000000e+00> : vector<4x20xf32>
    %74 = vector.multi_reduction <add>, %73, %cst_39 [2] : vector<4x20x20xf32> to vector<4x20xf32>
    %75 = vector.shape_cast %74 : vector<4x20xf32> to vector<4x20x1xf32>
    %76 = tpu.reciprocal %75 {approx = true} : vector<4x20x1xf32> -> vector<4x20x1xf32>
    %77 = vector.broadcast %76 : vector<4x20x1xf32> to vector<4x20x20xf32>
    %78 = arith.mulf %73, %77 : vector<4x20x20xf32>
    %79 = arith.truncf %78 : vector<4x20x20xf32> to vector<4x20x20xbf16>
    "tpu.trace_start"() <{level = 10 : i32, message = "hqk,hke->hqe"}> : () -> ()
    %cst_40 = arith.constant dense<0.000000e+00> : vector<4x20x32xf32>
    %80 = tpu.matmul %79, %62, %cst_40 {dimension_numbers = #tpu.dot_dimension_numbers<[2], [1], [1], [2], [0, 0, 0, 1, 1, 2], [0], [0]>} : vector<4x20x20xbf16>, vector<4x20x32xbf16>, vector<4x20x32xf32> -> vector<4x20x32xf32>
    "tpu.trace_stop"() : () -> ()
    %cst_41 = arith.constant dense<0.000000e+00> : vector<20x32xf32>
    %81 = vector.multi_reduction <add>, %80, %cst_41 [0] : vector<4x20x32xf32> to vector<20x32xf32>
    %82 = arith.truncf %81 : vector<20x32xf32> to vector<20x32xbf16>
    %c0_42 = arith.constant 0 : index
    %c0_43 = arith.constant 0 : index
    %c0_44 = arith.constant 0 : index
    %83 = vector.load %arg14[%c0_42, %c0_43, %c0_44] : memref<1x32x32xbf16, #tpu.memory_space<vmem>>, vector<1x32x32xbf16>
    %84 = vector.shape_cast %83 : vector<1x32x32xbf16> to vector<32x32xbf16>
    %cst_45 = arith.constant dense<0.000000e+00> : vector<20x32xf32>
    %85 = tpu.matmul %82, %84, %cst_45 {dimension_numbers = #tpu.dot_dimension_numbers<[1], [0], [0], [1], [0, 0, 1, 1], [], []>} : vector<20x32xbf16>, vector<32x32xbf16>, vector<20x32xf32> -> vector<20x32xf32>
    %86 = arith.addf %3, %85 : vector<20x32xf32>
    %c0_46 = arith.constant 0 : index
    %c0_47 = arith.constant 0 : index
    %c0_48 = arith.constant 0 : index
    %87 = vector.load %arg15[%c0_46, %c0_47, %c0_48] : memref<1x1x32xf32, #tpu.memory_space<vmem>>, vector<1x1x32xf32>
    %88 = vector.shape_cast %87 : vector<1x1x32xf32> to vector<1x32xf32>
    %89 = vector.broadcast %88 : vector<1x32xf32> to vector<20x32xf32>
    %90 = arith.addf %86, %89 : vector<20x32xf32>
    %c0_49 = arith.constant 0 : index
    %c0_50 = arith.constant 0 : index
    %c0_51 = arith.constant 0 : index
    %91 = vector.load %arg16[%c0_49, %c0_50, %c0_51] : memref<1x1x32xf32, #tpu.memory_space<vmem>>, vector<1x1x32xf32>
    %92 = vector.shape_cast %91 : vector<1x1x32xf32> to vector<1x32xf32>
    %c0_52 = arith.constant 0 : index
    %c0_53 = arith.constant 0 : index
    %c0_54 = arith.constant 0 : index
    %93 = vector.load %arg17[%c0_52, %c0_53, %c0_54] : memref<1x1x32xf32, #tpu.memory_space<vmem>>, vector<1x1x32xf32>
    %94 = vector.shape_cast %93 : vector<1x1x32xf32> to vector<1x32xf32>
    %cst_55 = arith.constant dense<0.000000e+00> : vector<20xf32>
    %95 = vector.multi_reduction <add>, %90, %cst_55 [1] : vector<20x32xf32> to vector<20xf32>
    %96 = vector.shape_cast %95 : vector<20xf32> to vector<20x1xf32>
    %cst_56 = arith.constant 3.200000e+01 : f32
    %97 = vector.broadcast %cst_56 : f32 to vector<20x1xf32>
    %98 = arith.divf %96, %97 : vector<20x1xf32>
    %99 = vector.broadcast %98 : vector<20x1xf32> to vector<20x32xf32>
    %100 = arith.subf %90, %99 : vector<20x32xf32>
    %101 = arith.mulf %100, %100 : vector<20x32xf32>
    %cst_57 = arith.constant dense<0.000000e+00> : vector<20xf32>
    %102 = vector.multi_reduction <add>, %101, %cst_57 [1] : vector<20x32xf32> to vector<20xf32>
    %103 = vector.shape_cast %102 : vector<20xf32> to vector<20x1xf32>
    %cst_58 = arith.constant 3.200000e+01 : f32
    %104 = vector.broadcast %cst_58 : f32 to vector<20x1xf32>
    %105 = arith.divf %103, %104 : vector<20x1xf32>
    %106 = vector.broadcast %98 : vector<20x1xf32> to vector<20x32xf32>
    %107 = arith.subf %90, %106 : vector<20x32xf32>
    %cst_59 = arith.constant 9.99999997E-7 : f32
    %108 = vector.broadcast %cst_59 : f32 to vector<20x1xf32>
    %109 = arith.addf %105, %108 : vector<20x1xf32>
    %110 = math.rsqrt %109 : vector<20x1xf32>
    %111 = vector.broadcast %110 : vector<20x1xf32> to vector<20x32xf32>
    %112 = arith.mulf %107, %111 : vector<20x32xf32>
    %113 = vector.broadcast %92 : vector<1x32xf32> to vector<20x32xf32>
    %114 = arith.mulf %112, %113 : vector<20x32xf32>
    %115 = vector.broadcast %94 : vector<1x32xf32> to vector<20x32xf32>
    %116 = arith.addf %114, %115 : vector<20x32xf32>
    %117 = arith.truncf %116 : vector<20x32xf32> to vector<20x32xbf16>
    %c0_60 = arith.constant 0 : index
    %c0_61 = arith.constant 0 : index
    %c0_62 = arith.constant 0 : index
    %118 = vector.load %arg18[%c0_60, %c0_61, %c0_62] : memref<1x32x128xbf16, #tpu.memory_space<vmem>>, vector<1x32x128xbf16>
    %119 = vector.shape_cast %118 : vector<1x32x128xbf16> to vector<32x128xbf16>
    %cst_63 = arith.constant dense<0.000000e+00> : vector<20x128xf32>
    %120 = tpu.matmul %117, %119, %cst_63 {dimension_numbers = #tpu.dot_dimension_numbers<[1], [0], [0], [1], [0, 0, 1, 1], [], []>} : vector<20x32xbf16>, vector<32x128xbf16>, vector<20x128xf32> -> vector<20x128xf32>
    %c0_64 = arith.constant 0 : index
    %c0_65 = arith.constant 0 : index
    %c0_66 = arith.constant 0 : index
    %121 = vector.load %arg19[%c0_64, %c0_65, %c0_66] : memref<1x1x128xf32, #tpu.memory_space<vmem>>, vector<1x1x128xf32>
    %122 = vector.shape_cast %121 : vector<1x1x128xf32> to vector<1x128xf32>
    %123 = vector.broadcast %122 : vector<1x128xf32> to vector<20x128xf32>
    %124 = arith.addf %120, %123 : vector<20x128xf32>
    %125 = arith.mulf %124, %124 : vector<20x128xf32>
    %126 = arith.mulf %124, %125 : vector<20x128xf32>
    %cst_67 = arith.constant 4.471500e-02 : f32
    %127 = vector.broadcast %cst_67 : f32 to vector<20x128xf32>
    %128 = arith.mulf %127, %126 : vector<20x128xf32>
    %129 = arith.addf %124, %128 : vector<20x128xf32>
    %cst_68 = arith.constant 0.797884583 : f32
    %130 = vector.broadcast %cst_68 : f32 to vector<20x128xf32>
    %131 = arith.mulf %130, %129 : vector<20x128xf32>
    %132 = math.tanh %131 : vector<20x128xf32>
    %cst_69 = arith.constant 1.000000e+00 : f32
    %133 = vector.broadcast %cst_69 : f32 to vector<20x128xf32>
    %134 = arith.addf %133, %132 : vector<20x128xf32>
    %cst_70 = arith.constant 5.000000e-01 : f32
    %135 = vector.broadcast %cst_70 : f32 to vector<20x128xf32>
    %136 = arith.mulf %135, %134 : vector<20x128xf32>
    %137 = arith.mulf %124, %136 : vector<20x128xf32>
    %138 = arith.truncf %137 : vector<20x128xf32> to vector<20x128xbf16>
    %c0_71 = arith.constant 0 : index
    %c0_72 = arith.constant 0 : index
    %c0_73 = arith.constant 0 : index
    %139 = vector.load %arg20[%c0_71, %c0_72, %c0_73] : memref<1x128x32xbf16, #tpu.memory_space<vmem>>, vector<1x128x32xbf16>
    %140 = vector.shape_cast %139 : vector<1x128x32xbf16> to vector<128x32xbf16>
    %cst_74 = arith.constant dense<0.000000e+00> : vector<20x32xf32>
    %141 = tpu.matmul %138, %140, %cst_74 {dimension_numbers = #tpu.dot_dimension_numbers<[1], [0], [0], [1], [0, 0, 1, 1], [], []>} : vector<20x128xbf16>, vector<128x32xbf16>, vector<20x32xf32> -> vector<20x32xf32>
    %142 = arith.addf %90, %141 : vector<20x32xf32>
    %c0_75 = arith.constant 0 : index
    %c0_76 = arith.constant 0 : index
    %c0_77 = arith.constant 0 : index
    %143 = vector.load %arg21[%c0_75, %c0_76, %c0_77] : memref<1x1x32xf32, #tpu.memory_space<vmem>>, vector<1x1x32xf32>
    %144 = vector.shape_cast %143 : vector<1x1x32xf32> to vector<1x32xf32>
    %145 = vector.broadcast %144 : vector<1x32xf32> to vector<20x32xf32>
    %146 = arith.addf %142, %145 : vector<20x32xf32>
    %c0_78 = arith.constant 0 : index
    %c0_79 = arith.constant 0 : index
    %147 = vector.load %arg25[%c0_78, %c0_79] : memref<20x32xf32, #tpu.memory_space<vmem>>, vector<20x32xf32>
    tpu.vector_store %arg25[%c0_78, %c0_79], %146 {strides = array<i32>} : memref<20x32xf32, #tpu.memory_space<vmem>>, vector<20x32xf32>,
    %c1_i32 = arith.constant 1 : i32
    %148 = arith.cmpi eq, %arg1, %c1_i32 : i32
    %149 = arith.extui %148 : i1 to i32
    %c0_i32_80 = arith.constant 0 : i32
    %150 = arith.cmpi ne, %149, %c0_i32_80 : i32
    scf.if %150 {
      %c0_81 = arith.constant 0 : index
      %c0_82 = arith.constant 0 : index
      %151 = vector.load %arg22[%c0_81, %c0_82] : memref<1x32xf32, #tpu.memory_space<vmem>>, vector<1x32xf32>
      %c0_83 = arith.constant 0 : index
      %c0_84 = arith.constant 0 : index
      %152 = vector.load %arg23[%c0_83, %c0_84] : memref<1x32xf32, #tpu.memory_space<vmem>>, vector<1x32xf32>
      %cst_85 = arith.constant dense<0.000000e+00> : vector<20xf32>
      %153 = vector.multi_reduction <add>, %146, %cst_85 [1] : vector<20x32xf32> to vector<20xf32>
      %154 = vector.shape_cast %153 : vector<20xf32> to vector<20x1xf32>
      %cst_86 = arith.constant 3.200000e+01 : f32
      %155 = vector.broadcast %cst_86 : f32 to vector<20x1xf32>
      %156 = arith.divf %154, %155 : vector<20x1xf32>
      %157 = vector.broadcast %156 : vector<20x1xf32> to vector<20x32xf32>
      %158 = arith.subf %146, %157 : vector<20x32xf32>
      %159 = arith.mulf %158, %158 : vector<20x32xf32>
      %cst_87 = arith.constant dense<0.000000e+00> : vector<20xf32>
      %160 = vector.multi_reduction <add>, %159, %cst_87 [1] : vector<20x32xf32> to vector<20xf32>
      %161 = vector.shape_cast %160 : vector<20xf32> to vector<20x1xf32>
      %cst_88 = arith.constant 3.200000e+01 : f32
      %162 = vector.broadcast %cst_88 : f32 to vector<20x1xf32>
      %163 = arith.divf %161, %162 : vector<20x1xf32>
      %164 = vector.broadcast %156 : vector<20x1xf32> to vector<20x32xf32>
      %165 = arith.subf %146, %164 : vector<20x32xf32>
      %cst_89 = arith.constant 9.99999997E-7 : f32
      %166 = vector.broadcast %cst_89 : f32 to vector<20x1xf32>
      %167 = arith.addf %163, %166 : vector<20x1xf32>
      %168 = math.rsqrt %167 : vector<20x1xf32>
      %169 = vector.broadcast %168 : vector<20x1xf32> to vector<20x32xf32>
      %170 = arith.mulf %165, %169 : vector<20x32xf32>
      %171 = vector.broadcast %151 : vector<1x32xf32> to vector<20x32xf32>
      %172 = arith.mulf %170, %171 : vector<20x32xf32>
      %173 = vector.broadcast %152 : vector<1x32xf32> to vector<20x32xf32>
      %174 = arith.addf %172, %173 : vector<20x32xf32>
      %c0_90 = arith.constant 0 : index
      %c0_91 = arith.constant 0 : index
      %c0_92 = arith.constant 0 : index
      %175 = vector.load %arg24[%c0_90, %c0_91, %c0_92] : memref<1x20x32xf32, #tpu.memory_space<vmem>>, vector<1x20x32xf32>
      %176 = vector.shape_cast %175 : vector<1x20x32xf32> to vector<20x32xf32>
      %177 = vector.shape_cast %174 : vector<20x32xf32> to vector<1x20x32xf32>
      tpu.vector_store %arg24[%c0_90, %c0_91, %c0_92], %177 {strides = array<i32>} : memref<1x20x32xf32, #tpu.memory_space<vmem>>, vector<1x20x32xf32>,
    } else {
    }
    return
  }
  func.func @transform_0(%arg0: i32, %arg1: i32) -> (i32, i32, i32) {
    %c0_i32 = arith.constant 0 : i32
    %c0_i32_0 = arith.constant 0 : i32
    %c0_i32_1 = arith.constant 0 : i32
    return %arg0, %c0_i32, %c0_i32_0 : i32, i32, i32
  }
  func.func @transform_1(%arg0: i32, %arg1: i32) -> (i32, i32) {
    %c0_i32 = arith.constant 0 : i32
    %c0_i32_0 = arith.constant 0 : i32
    %c0_i32_1 = arith.constant 0 : i32
    return %c0_i32, %c0_i32_0 : i32, i32
  }
  func.func @transform_2(%arg0: i32, %arg1: i32) -> (i32, i32) {
    %c0_i32 = arith.constant 0 : i32
    %c0_i32_0 = arith.constant 0 : i32
    %c0_i32_1 = arith.constant 0 : i32
    return %c0_i32, %c0_i32_0 : i32, i32
  }
  func.func @transform_3(%arg0: i32, %arg1: i32) -> (i32, i32, i32) {
    %c0_i32 = arith.constant 0 : i32
    %c0_i32_0 = arith.constant 0 : i32
    %c0_i32_1 = arith.constant 0 : i32
    %c0_i32_2 = arith.constant 0 : i32
    return %c0_i32, %c0_i32_0, %c0_i32_1 : i32, i32, i32
  }
  func.func @transform_4(%arg0: i32, %arg1: i32) -> (i32, i32, i32) {
    %c0_i32 = arith.constant 0 : i32
    %c0_i32_0 = arith.constant 0 : i32
    %c0_i32_1 = arith.constant 0 : i32
    return %arg1, %c0_i32, %c0_i32_0 : i32, i32, i32
  }
  func.func @transform_5(%arg0: i32, %arg1: i32) -> (i32, i32, i32) {
    %c0_i32 = arith.constant 0 : i32
    %c0_i32_0 = arith.constant 0 : i32
    %c0_i32_1 = arith.constant 0 : i32
    return %arg1, %c0_i32, %c0_i32_0 : i32, i32, i32
  }
  func.func @transform_6(%arg0: i32, %arg1: i32) -> (i32, i32, i32) {
    %c0_i32 = arith.constant 0 : i32
    %c0_i32_0 = arith.constant 0 : i32
    %c0_i32_1 = arith.constant 0 : i32
    return %arg1, %c0_i32, %c0_i32_0 : i32, i32, i32
  }
  func.func @transform_7(%arg0: i32, %arg1: i32) -> (i32, i32, i32) {
    %c0_i32 = arith.constant 0 : i32
    %c0_i32_0 = arith.constant 0 : i32
    %c0_i32_1 = arith.constant 0 : i32
    return %arg1, %c0_i32, %c0_i32_0 : i32, i32, i32
  }
  func.func @transform_8(%arg0: i32, %arg1: i32) -> (i32, i32, i32) {
    %c0_i32 = arith.constant 0 : i32
    %c0_i32_0 = arith.constant 0 : i32
    %c0_i32_1 = arith.constant 0 : i32
    return %arg1, %c0_i32, %c0_i32_0 : i32, i32, i32
  }
  func.func @transform_9(%arg0: i32, %arg1: i32) -> (i32, i32, i32) {
    %c0_i32 = arith.constant 0 : i32
    %c0_i32_0 = arith.constant 0 : i32
    %c0_i32_1 = arith.constant 0 : i32
    return %arg1, %c0_i32, %c0_i32_0 : i32, i32, i32
  }
  func.func @transform_10(%arg0: i32, %arg1: i32) -> (i32, i32, i32) {
    %c0_i32 = arith.constant 0 : i32
    %c0_i32_0 = arith.constant 0 : i32
    %c0_i32_1 = arith.constant 0 : i32
    return %arg1, %c0_i32, %c0_i32_0 : i32, i32, i32
  }
  func.func @transform_11(%arg0: i32, %arg1: i32) -> (i32, i32, i32) {
    %c0_i32 = arith.constant 0 : i32
    %c0_i32_0 = arith.constant 0 : i32
    %c0_i32_1 = arith.constant 0 : i32
    return %arg1, %c0_i32, %c0_i32_0 : i32, i32, i32
  }
  func.func @transform_12(%arg0: i32, %arg1: i32) -> (i32, i32, i32) {
    %c0_i32 = arith.constant 0 : i32
    %c0_i32_0 = arith.constant 0 : i32
    %c0_i32_1 = arith.constant 0 : i32
    return %arg1, %c0_i32, %c0_i32_0 : i32, i32, i32
  }
  func.func @transform_13(%arg0: i32, %arg1: i32) -> (i32, i32, i32) {
    %c0_i32 = arith.constant 0 : i32
    %c0_i32_0 = arith.constant 0 : i32
    %c0_i32_1 = arith.constant 0 : i32
    return %arg1, %c0_i32, %c0_i32_0 : i32, i32, i32
  }
  func.func @transform_14(%arg0: i32, %arg1: i32) -> (i32, i32, i32) {
    %c0_i32 = arith.constant 0 : i32
    %c0_i32_0 = arith.constant 0 : i32
    %c0_i32_1 = arith.constant 0 : i32
    return %arg1, %c0_i32, %c0_i32_0 : i32, i32, i32
  }
  func.func @transform_15(%arg0: i32, %arg1: i32) -> (i32, i32, i32) {
    %c0_i32 = arith.constant 0 : i32
    %c0_i32_0 = arith.constant 0 : i32
    %c0_i32_1 = arith.constant 0 : i32
    return %arg1, %c0_i32, %c0_i32_0 : i32, i32, i32
  }
  func.func @transform_16(%arg0: i32, %arg1: i32) -> (i32, i32, i32) {
    %c0_i32 = arith.constant 0 : i32
    %c0_i32_0 = arith.constant 0 : i32
    %c0_i32_1 = arith.constant 0 : i32
    return %arg1, %c0_i32, %c0_i32_0 : i32, i32, i32
  }
  func.func @transform_17(%arg0: i32, %arg1: i32) -> (i32, i32, i32) {
    %c0_i32 = arith.constant 0 : i32
    %c0_i32_0 = arith.constant 0 : i32
    %c0_i32_1 = arith.constant 0 : i32
    return %arg1, %c0_i32, %c0_i32_0 : i32, i32, i32
  }
  func.func @transform_18(%arg0: i32, %arg1: i32) -> (i32, i32, i32) {
    %c0_i32 = arith.constant 0 : i32
    %c0_i32_0 = arith.constant 0 : i32
    %c0_i32_1 = arith.constant 0 : i32
    return %arg1, %c0_i32, %c0_i32_0 : i32, i32, i32
  }
  func.func @transform_19(%arg0: i32, %arg1: i32) -> (i32, i32, i32) {
    %c0_i32 = arith.constant 0 : i32
    %c0_i32_0 = arith.constant 0 : i32
    %c0_i32_1 = arith.constant 0 : i32
    return %arg1, %c0_i32, %c0_i32_0 : i32, i32, i32
  }
  func.func @transform_20(%arg0: i32, %arg1: i32) -> (i32, i32) {
    %c0_i32 = arith.constant 0 : i32
    %c0_i32_0 = arith.constant 0 : i32
    %c0_i32_1 = arith.constant 0 : i32
    return %c0_i32, %c0_i32_0 : i32, i32
  }
  func.func @transform_21(%arg0: i32, %arg1: i32) -> (i32, i32) {
    %c0_i32 = arith.constant 0 : i32
    %c0_i32_0 = arith.constant 0 : i32
    %c0_i32_1 = arith.constant 0 : i32
    return %c0_i32, %c0_i32_0 : i32, i32
  }
  func.func @transform_22(%arg0: i32, %arg1: i32) -> (i32, i32, i32) {
    %c0_i32 = arith.constant 0 : i32
    %c0_i32_0 = arith.constant 0 : i32
    %c0_i32_1 = arith.constant 0 : i32
    return %arg0, %c0_i32, %c0_i32_0 : i32, i32, i32
  }
}

</mosaic_0001>

<bundles_post_ra>
// kernel: tpu_custom_call.1
= control target key start
LH: loop header
LB: loop body
LE: loop exit
PB: predicated region body
PF: predicated region fallthrough
CT: control target
= control target key end

     0   :  { %s3894_s28 = smov 0   ;;  %s3896_s29 = smov 0   ;;  %s4560_s0 = inlined_call_operand.vmem [shape: bf16[2,20,48], index: 0, kind: input, shape index: {}]   ;;  %s4561_s1 = inlined_call_operand.vmem [shape: bf16[48,32], index: 1, kind: input, shape index: {}]   ;;  %s4562_s2 = inlined_call_operand.vmem [shape: f32[20,32], index: 2, kind: input, shape index: {}]   ;;  %s4563_s3 = inlined_call_operand.vmem [shape: f32[4,1,32], index: 3, kind: input, shape index: {}]   ;;  %s4564_s4 = inlined_call_operand.vmem [shape: f32[2,1,32], index: 4, kind: input, shape index: {}]   ;;  %s4565_s5 = inlined_call_operand.vmem [shape: f32[2,1,32], index: 5, kind: input, shape index: {}]   ;;  %s4566_s6 = inlined_call_operand.vmem [shape: bf16[2,32,32], index: 6, kind: input, shape index: {}]   ;;  %s4567_s7 = inlined_call_operand.vmem [shape: f32[2,1,32], index: 7, kind: input, shape index: {}]   ;;  %s4568_s8 = inlined_call_operand.vmem [shape: bf16[2,32,32], index: 8, kind: input, shape index: {}]   ;;  %s4569_s9 = inlined_call_operand.vmem [shape: f32[2,1,32], index: 9, kind: input, shape index: {}]   ;;  %s4570_s10 = inlined_call_operand.vmem [shape: bf16[2,32,32], index: 10, kind: input, shape index: {}]   ;;  %s4571_s11 = inlined_call_operand.vmem [shape: f32[2,1,32], index: 11, kind: input, shape index: {}]   ;;  %s4572_s12 = inlined_call_operand.vmem [shape: bf16[2,32,32], index: 12, kind: input, shape index: {}]   ;;  %s4573_s13 = inlined_call_operand.vmem [shape: f32[2,1,32], index: 13, kind: input, shape index: {}]   ;;  %s4574_s14 = inlined_call_operand.vmem [shape: f32[2,1,32], index: 14, kind: input, shape index: {}]   ;;  %s4575_s15 = inlined_call_operand.vmem [shape: f32[2,1,32], index: 15, kind: input, shape index: {}]   ;;  %s4576_s16 = inlined_call_operand.vmem [shape: bf16[2,32,128], index: 16, kind: input, shape index: {}]   ;;  %s4577_s17 = inlined_call_operand.vmem [shape: f32[2,1,128], index: 17, kind: input, shape index: {}]   ;;  %s4578_s18 = inlined_call_operand.vmem [shape: bf16[2,128,32], index: 18, kind: input, shape index: {}]   ;;  %s4579_s19 = inlined_call_operand.vmem [shape: f32[2,1,32], index: 19, kind: input, shape index: {}]   ;;  %s4580_s20 = inlined_call_operand.vmem [shape: f32[1,32], index: 20, kind: input, shape index: {}]   ;;  %s4581_s21 = inlined_call_operand.vmem [shape: f32[1,32], index: 21, kind: input, shape index: {}]   ;;  %s4582_s22 = inlined_call_operand.vmem [shape: f32[2,20,32], index: 22, kind: output, shape index: {}]  }
   0x1   :  { %4590 = sst [smem:[#allocation9_spill]] %s4560_s0  ;;  %s3898_s30 = smov 0  }
   0x2   :  { %4591 = sst [smem:[#allocation10_spill]] %s4561_s1 }
   0x3   :  { %4592 = sst [smem:[#allocation11_spill]] %s4562_s2 }
   0x4   :  { %4593 = sst [smem:[#allocation12_spill]] %s4563_s3  ;;  %s3892_s3 = smov 0  }
   0x5   :  { %4594 = sst [smem:[#allocation13_spill]] %s4564_s4  ;;  %s3900_s4 = smov 0  }
   0x6   :  { %4595 = sst [smem:[#allocation14_spill]] %s4565_s5 }
   0x7   :  { %4596 = sst [smem:[#allocation15_spill]] %s4566_s6 }
   0x8   :  { %4597 = sst [smem:[#allocation16_spill]] %s4568_s8 }
   0x9   :  { %4598 = sst [smem:[#allocation17_spill]] %s4569_s9 }
   0xa   :  { %4599 = sst [smem:[#allocation18_spill]] %s4570_s10 }
   0xb   :  { %4600 = sst [smem:[#allocation19_spill]] %s4572_s12 }
   0xc   :  { %4601 = sst [smem:[#allocation20_spill]] %s4573_s13 }
   0xd   :  { %4602 = sst [smem:[#allocation21_spill]] %s4574_s14 }
   0xe   :  { %4603 = sst [smem:[#allocation22_spill]] %s4576_s16 }
   0xf   :  { %4604 = sst [smem:[#allocation23_spill]] %s4578_s18 }
  0x10   :  { %4605 = sst [smem:[#allocation24_spill]] %s4579_s19 }
  0x11   :  { %4606 = sst [smem:[#allocation25_spill]] %s4580_s20 }
  0x12   :  { %4607 = sst [smem:[#allocation26_spill]] %s4581_s21 }
  0x13   :  { %4608 = sst [smem:[#allocation27_spill]] %s4582_s22 }
  0x14 LB: > { %4609 = sst [smem:[#allocation3_spill]] %s3754_s3  ;;  %s41_s0 = sadd.s32 1, %s3762_s29  ;;  %s3770_s4 = sphi %s3900_s4, %s32_s4   ;;  %s3766_s30 = sphi %s3898_s30, %s4658_s30   ;;  %s3762_s29 = sphi %s3896_s29, %s4657_s29   ;;  %s3758_s28 = sphi %s3894_s28, %s4656_s28   ;;  %s3754_s3 = sphi %s3892_s3, %s4655_s3  }
  0x15   : > { %4610 = sst [smem:[#allocation4_spill]] %s3762_s29  ;;  %s44_s23 = sadd.s32 1, %s3766_s30 }
  0x16   : > { %4611 = sst [smem:[#allocation5_spill]] %s3766_s30  ;;  %p42_p0 = scmp.ge.s32.totalorder %s41_s0, 2 }
  0x17   : > { %4612 = sst [smem:[#allocation6_spill]] %s3770_s4  ;;  %p3290_p1 = scmp.ge.s32.totalorder %s3770_s4, 1 }
  0x18   : > { %p764_p2 = scmp.lt.s32.totalorder %s3770_s4, 5  ;;  %s4660_s0 = smov (%p42_p0, %s41_s0), 0 }
  0x19   : > { %4613 = sst [smem:[#allocation7_spill]] %s4660_s0  ;;  %s4662_s23 = smov (!%p42_p0, %s44_s23), %s3766_s30 }
  0x1a   : > { %p765_p3 = pnand %p3290_p1, %p764_p2  ;;  %p46_p4 = scmp.ge.s32.totalorder %s4662_s23, 2 }
  0x1b   : > { %p886_p5 = scmp.lt.s32.totalorder (!%p765_p3), %s3758_s28, 1  ;;  %p891_p6 = scmp.lt.s32.totalorder (!%p765_p3), %s3754_s3, 1 }
  0x1c   : > { %s4664_s23 = smov (%p46_p4, %s4662_s23), 0  ;;  %768 = sbr.rel (%p765_p3) target bundleno = 2971 (0xb9b), region = 108 }
  0x1d   : > { %4614 = sst [smem:[#allocation8_spill]] %s4664_s23  ;;  %s4617_s4 = sld [smem:[#allocation9_spill]] (!%p765_p3) }
  0x1e   : > { %s4618_s18 = sld [smem:[#allocation15_spill]] (!%p765_p3)  ;;  %s4619_s8 = sld [smem:[#allocation16_spill]] (!%p765_p3) }
  0x1f   : > { %s4621_s10 = sld [smem:[#allocation18_spill]] (!%p765_p3)  ;;  %s4622_s12 = sld [smem:[#allocation19_spill]] (!%p765_p3) }
  0x20   : > { %s4625_s16 = sld [smem:[#allocation22_spill]] (!%p765_p3)  ;;  %s4627_s30 = sld [smem:[#allocation23_spill]] (!%p765_p3) }
  0x21   : > { %s4628_s9 = sld [smem:[#allocation27_spill]] (!%p765_p3) }
  0x23   : > { %s4666_s28 = smov (!%p886_p5, %s3758_s28), 1 }
  0x24   : > { %s3926_s1 = scalar_select %p891_p6, %s3754_s3, 1 }
  0x25   : > { %s3571_s5 = smul.u32 12, %s4666_s28 }
  0x26   : > { %s3377_s20 = sshll.u32 %s3926_s1, 4 }
  0x27   : > { %s3939_s21 = scalar_lea.vmem %s4617_s4, %s3571_s5  ;;  %s3945_s19 = scalar_lea.vmem %s4618_s18, %s3377_s20 }
  0x28   : > { %s3954_s23 = scalar_lea.vmem %s4619_s8, %s3377_s20  ;;  %s3963_s0 = scalar_lea.vmem %s4621_s10, %s3377_s20 }
  0x29   : > { %s3972_s25 = scalar_lea.vmem %s4622_s12, %s3377_s20  ;;  %s3989_s22 = scalar_lea.vmem %s4625_s16, %s3377_s20 }
  0x2a   : > { %s3382_s12 = sshll.u32 %s3926_s1, 6  ;;  %s4626_s8 = sld [smem:[#allocation24_spill]] }
  0x2b   : > { %s4003_s14 = scalar_lea.vmem %s4627_s30, %s3382_s12  ;;  %s3572_s4 = smul.u32 24, %s4666_s28 }
  0x2c   : > { %s4629_s18 = sld [smem:[#allocation3_spill]] }
  0x2d   : > { %s4008_s20 = scalar_lea.vmem %s4628_s9, %s3572_s4 }
  0x30   : > { %s950_s13 = scalar_lea.vmem %s4626_s8, %s3926_s1 }
  0x32   : > { %p3305_p7 = scmp.ne.s32.totalorder %s4629_s18, 0 }
  0x33   : > { %s4630_s3 = sld [smem:[#allocation10_spill]] (!%p3305_p7)  ;;  %vm999_vm0 = vcmask (!%p3305_p7), 392192   ;;  %v3621_v2 = vld [vmem:[%s3939_s21] sm:$0xff] (!%p3305_p7)   ;;  %v3622_v4 = vld [vmem:[%s3939_s21 + $0x8] ss:$0 sps:$4 sm:$0x33] (!%p3305_p7)  }
  0x34   : > { %960 = sbr.rel (%p3305_p7) target bundleno = 288 (0x120), region = 112  ;;  %3447 = vmatprep.mubr.msk.bf16.mxu0 (!%p3305_p7), %vm999_vm0, %v3621_v2  ;;  %vm1057_vm1 = vcmask (!%p3305_p7), 257024   ;;  %vm1054_vm2 = vcmask (!%p3305_p7), 261120  }
  0x39   : > { %s4631_s16 = smov (!%p3305_p7), %s4630_s3  ;;  %v3618_v0 = vld [vmem:[%s4630_s3] sm:$0xff] (!%p3305_p7)   ;;  %s4632_s3 = sld [smem:[#allocation11_spill]] (!%p3305_p7) }
  0x3a   : > { %v3619_v1 = vld [vmem:[%s4631_s16 + $0x8] sm:$0xff] (!%p3305_p7)   ;;  %3441 = vmatprep.subr.bf16.mxu0 (!%p3305_p7), %v3618_v0  ;;  %v3620_v3 = vld [vmem:[%s4631_s16 + $0x10] sm:$0xff] (!%p3305_p7)  }
  0x3b   : > { %3442 = vmatpush3.bf16.msra.mxu0 %v3618_v0 }
  0x3c   : > { %3443 = vmatprep.subr.bf16.mxu0 %v3619_v1 }
  0x3f   : > { %3444 = vmatpush3.bf16.msra.mxu0 %v3619_v1  ;;  %s4633_s2 = smov %s4632_s3  ;;  %v972_v5 = vld [vmem:[%s4632_s3 + $0x10] sm:$0xf] }
  0x40   : > { %3445 = vmatprep.subr.bf16.mxu0 %v3620_v3  ;;  %v970_v6 = vld [vmem:[%s4633_s2] sm:$0xff]  ;;  %v971_v10 = vld [vmem:[%s4633_s2 + $0x8] sm:$0xff] }
  0x43   : > { %3446 = vmatpush3.bf16.msra.mxu0 %v3620_v3 }
  0x46   : > { %3448 = vmatmul.mubr.msk.bf16.vlgmr.msra.gmra.mrb[0].mxu0 %vm999_vm0, %v3622_v4 }
 0x119   : > { %v3449_v7 = vpop.f32.mrb[0].mxu0 }
 0x11a   : > { %v1049_v8 = vadd.f32 %v3449_v7, %v972_v5  ;;  %v1040_v9 = vpop.f32.mrb[1].mxu0 }
 0x11b   : > { %v1041_v11 = vadd.f32 %v1040_v9, %v970_v6  ;;  %v3450_v12 = vpop.f32.mrb[2].mxu0 }
 0x11c   : > { %1058 = vst.msk [vmem:[#allocation2 + $0x10] sm:$0xf] %vm1057_vm1, %v1049_v8  ;;  %v1043_v13 = vpop.f32.mrb[3].mxu0 }
 0x11d   : > { %1055 = vst.msk [vmem:[#allocation2] sm:$0xff] %vm1054_vm2, %v1041_v11  ;;  %v1044_v14 = vadd.f32 %v1043_v13, %v971_v10 }
 0x11f   : > { %1056 = vst.msk [vmem:[#allocation2 + $0x8] sm:$0xff] %vm1054_vm2, %v1044_v14 }
 0x120 PF: > { %vm1068_vm3 = vcmask 261120   ;;  %vm1075_vm4 = vcmask 257024   ;;  %v3623_v36 = vld [vmem:[%s3945_s19] sm:$0xff]   ;;  %v3625_v38 = vld [vmem:[%s3945_s19 + $0x8] sm:$0xff]   ;;  %s4636_s6 = sld [smem:[#allocation14_spill]]  ;;  %v3772_v3 = vmov 0.0   ;;  %v1427_v6 = vlaneseq  ;;  %s4638_s10 = scalar_lea.vmem %s4567_s7, %s3926_s1 }
 0x121   : > { %v3624_v37 = vld [vmem:[%s3954_s23] sm:$0xff]   ;;  %v3626_v39 = vld [vmem:[%s3954_s23 + $0x8] sm:$0xff]   ;;  %3451 = vmatprep.subr.bf16.mxu0 %v3623_v36  ;;  %s4634_s23 = sld [smem:[#allocation13_spill]]  ;;  %vm3773_vm5 = vmmov 0   ;;  %v3774_v4 = vmov 1983009808  }
 0x122   : > { %3459 = vmatprep.subr.bf16.mxu1 %v3624_v37  ;;  %3452 = vmatpush3.bf16.msra.mxu0 %v3623_v36  ;;  %v3627_v40 = vld [vmem:[%s3963_s0] sm:$0xff]   ;;  %v3628_v2 = vld [vmem:[%s3963_s0 + $0x8] sm:$0xff]   ;;  %v1425_v5 = vunpack.c.l.s4 %v3774_v4  ;;  %v4067_v9 = vshrl.u32 %v1427_v6, 7  ;;  %s4639_s30 = sld [smem:[#allocation17_spill]]  ;;  %s4641_s4 = sld [smem:[#allocation12_spill]]  ;;  %vm2368_vm6 = vcmask 1041408  }
 0x123   : > { %v1061_v16 = vld [vmem:[#allocation2 + $0x10] sm:$0xf]  ;;  %3460 = vmatpush3.bf16.msra.mxu1 %v3624_v37  ;;  %3453 = vmatprep.subr.bf16.mxu0 %v3625_v38  ;;  %v3315_v7 = vld [vmem:[%s4638_s10] ss:$0 sm:$0xff]  ;;  %s4643_s0 = scalar_lea.vmem %s4571_s11, %s3926_s1  ;;  %vm1780_vm7 = vcmask 162816   ;;  %vm1787_vm8 = vcmask 158720  }
 0x124   : > { %v1059_v15 = vld [vmem:[#allocation2] sm:$0xff]  ;;  %v1076_v19 = vsel %vm1075_vm4, %v1061_v16, 0.0  ;;  %3461 = vmatprep.subr.bf16.mxu1 %v3626_v39  ;;  %v1426_v8 = vunpack.c.0.s8 %v1425_v5  ;;  %s4644_s10 = sld [smem:[#allocation20_spill]] }
 0x125   : > { %v1069_v18 = vsel %vm1068_vm3, %v1059_v15, 0.0  ;;  %1077 = vadd.xlane.f32.xlu1 %v1076_v19 }
 0x126   : > { %v1060_v17 = vld [vmem:[#allocation2 + $0x8] sm:$0xff]  ;;  %1070 = vadd.xlane.f32.xlu0 %v1069_v18  ;;  %3454 = vmatpush3.bf16.msra.mxu0 %v3625_v38  ;;  %s4637_s8 = scalar_lea.vmem %s4636_s6, %s3926_s1 }
 0x127   : > { %v1072_v20 = vsel %vm1068_vm3, %v1060_v17, 0.0  ;;  %3462 = vmatpush3.bf16.msra.mxu1 %v3626_v39  ;;  %3467 = vmatprep.subr.bf16.mxu0 %v3627_v40  ;;  %s4635_s9 = scalar_lea.vmem %s4634_s23, %s3926_s1  ;;  %v3314_v58 = vld [vmem:[%s4637_s8] ss:$0 sm:$0xff]  ;;  %s4649_s23 = scalar_lea.vmem %s4577_s17, %s3926_s1 }
 0x128   : > { %v3313_v52 = vld [vmem:[%s4635_s9] ss:$0 sm:$0xff]  ;;  %3475 = vmatprep.subr.bf16.mxu1 %v3772_v3  ;;  %s4640_s3 = scalar_lea.vmem %s4639_s30, %s3926_s1  ;;  %s4642_s5 = smov %s4641_s4 }
 0x129   : > { %v3320_v10 = vld [vmem:[%s4640_s3] ss:$0 sm:$0xff]  ;;  %v4082_v12 = vld [vmem:[%s4642_s5 + $0x1] ss:$0 sm:$0xff]  ;;  %v4087_v13 = vld [vmem:[%s4642_s5 + $0x2] ss:$0 sm:$0xff] }
 0x12a   : > { %1073 = vadd.xlane.f32.xlu0 %v1072_v20  ;;  %v4077_v11 = vld [vmem:[%s4641_s4] ss:$0 sm:$0xff]  ;;  %v4092_v14 = vld [vmem:[%s4642_s5 + $0x3] ss:$0 sm:$0xff]  ;;  %s4645_s12 = scalar_lea.vmem %s4644_s10, %s3926_s1  ;;  %s4646_s30 = sld [smem:[#allocation21_spill]] }
 0x12b   : > { %s4648_s4 = scalar_lea.vmem %s4575_s15, %s3926_s1 }
 0x130   : > { %s4647_s3 = scalar_lea.vmem %s4646_s30, %s3926_s1  ;;  %s4651_s1 = sld [smem:[#allocation3_spill]] }
 0x136   : > { %p3372_p8 = scmp.ne.s32.totalorder %s4651_s1, 1 }
 0x137   : > { %s4652_s6 = sld [smem:[#allocation25_spill]] (!%p3372_p8) }
 0x1b2   : > { %v1078_v22 = vpop.xlane.xlu1 %1077 }
 0x1b3   : > { %v1071_v21 = vpop.xlane.xlu0 %1070  ;;  %v1082_v24 = vmul.f32 0.03125, %v1078_v22 }
 0x1b4   : > { %v1080_v23 = vmul.f32 0.03125, %v1071_v21  ;;  %v4095_v21 = vsub.s32 %v1426_v8, %v4067_v9 }
 0x1b5   : > { %v1085_v26 = vsub.f32 %v1061_v16, %v1082_v24 }
 0x1b6   : > { %v1083_v25 = vsub.f32 %v1059_v15, %v1080_v23 }
 0x1b7   : > { %v1074_v27 = vpop.xlane.xlu0 %1073  ;;  %v1088_v30 = vmul.f32 %v1085_v26, %v1085_v26 }
 0x1b8   : > { %v1081_v28 = vmul.f32 0.03125, %v1074_v27  ;;  %v1086_v29 = vmul.f32 %v1083_v25, %v1083_v25 }
 0x1b9   : > { %v1095_v33 = vsel %vm1075_vm4, %v1088_v30, 0.0 }
 0x1ba   : > { %v1084_v31 = vsub.f32 %v1060_v17, %v1081_v28  ;;  %v1089_v32 = vsel %vm1068_vm3, %v1086_v29, 0.0 }
 0x1bb   : > { %1090 = vadd.xlane.f32.xlu1 %v1089_v32 }
 0x1bc   : > { %v1087_v34 = vmul.f32 %v1084_v31, %v1084_v31 }
 0x1be   : > { %v1092_v35 = vsel %vm1068_vm3, %v1087_v34, 0.0 }
 0x1bf   : > { %1096 = vadd.xlane.f32.xlu1 %v1095_v33  ;;  %1093 = vadd.xlane.f32.xlu0 %v1092_v35 }
 0x248   : > { %v1091_v41 = vpop.xlane.xlu1 %1090 }
 0x249   : > { %v1098_v42 = vmul.f32 0.03125, %v1091_v41 }
 0x24b   : > { %v1101_v43 = vadd.f32 1e-06, %v1098_v42  ;;  %v3325_v42 = vld [vmem:[%s4643_s0] ss:$0 sm:$0xff] }
 0x24c   : > { %v1097_v44 = vpop.xlane.xlu1 %1096  ;;  %v1094_v45 = vpop.xlane.xlu0 %1093 }
 0x24d   : > { %3641 = vrsqrt.f32 %v1101_v43  ;;  %v1100_v46 = vmul.f32 0.03125, %v1097_v44  ;;  %v1099_v47 = vmul.f32 0.03125, %v1094_v45 }
 0x24f   : > { %v1103_v48 = vadd.f32 1e-06, %v1100_v46  ;;  %v1102_v49 = vadd.f32 1e-06, %v1099_v47 }
 0x251   : > { %3643 = vrsqrt.f32 %v1103_v48 }
 0x252   : > { %3645 = vrsqrt.f32 %v1102_v49 }
 0x257   : > { %v3642_v50 = vpop.eup %3641 }
 0x258   : > { %v1107_v51 = vmul.f32 %v3642_v50, %v1083_v25 }
 0x25a   : > { %v1116_v57 = vmul.f32 %v3313_v52, %v1107_v51 }
 0x25b   : > { %v3644_v53 = vpop.eup %3643 }
 0x25c   : > { %v3646_v54 = vpop.eup %3645  ;;  %v1109_v55 = vmul.f32 %v3644_v53, %v1085_v26  ;;  %v1125_v62 = vadd.f32 %v3314_v58, %v1116_v57 }
 0x25d   : > { %v1108_v56 = vmul.f32 %v3646_v54, %v1084_v31 }
 0x25e   : > { %v1118_v59 = vmul.f32 %v3313_v52, %v1109_v55 }
 0x25f   : > { %v1117_v60 = vmul.f32 %v3313_v52, %v1108_v56 }
 0x260   : > { %v1127_v61 = vadd.f32 %v3314_v58, %v1118_v59 }
 0x261   : > { %v1126_v63 = vadd.f32 %v3314_v58, %v1117_v60 }
 0x262   : > { %v1129_v0 = vpack.c.bf16 %v1127_v61, %v1127_v61 }
 0x263   : > { %v1128_v1 = vpack.c.bf16 %v1126_v63, %v1125_v62 }
 0x265   : > { %3455 = vmatprep.mubr.msk.bf16.mxu0 %vm1068_vm3, %v1128_v1  ;;  %3463 = vmatprep.mubr.msk.bf16.mxu1 %vm1068_vm3, %v1128_v1 }
 0x266   : > { %3456 = vmatmul.mubr.msk.bf16.vlgmr.msra.gmra.mrb[0].mxu0 %vm1068_vm3, %v1129_v0  ;;  %3464 = vmatmul.mubr.msk.bf16.vlgmr.msra.gmra.mrb[0].mxu1 %vm1068_vm3, %v1129_v0 }
 0x267   : > { %3468 = vmatpush3.bf16.msra.mxu0 %v3627_v40  ;;  %3471 = vmatprep.mubr.msk.bf16.mxu0 %vm1068_vm3, %v1128_v1 }
 0x268   : > { %3469 = vmatprep.subr.bf16.mxu0 %v3628_v2  ;;  %3479 = vmatprep.mubr.msk.bf16.mxu1 %vm3773_vm5, %v3772_v3 }
 0x26b   : > { %3470 = vmatpush3.bf16.msra.mxu0 %v3628_v2 }
 0x26e   : > { %3472 = vmatmul.mubr.msk.bf16.vlgmr.msra.gmra.mrb[4].mxu0 %vm1068_vm3, %v1129_v0 }
 0x339   : > { %v3457_v15 = vpop.f32.mrb[0].mxu0  ;;  %v3465_v16 = vpop.f32.mrb[0].mxu1 }
 0x33a   : > { %v1202_v17 = vadd.f32 %v3457_v15, %v3315_v7  ;;  %v1273_v18 = vadd.f32 %v3465_v16, %v3320_v10  ;;  %v1193_v19 = vpop.f32.mrb[1].mxu0  ;;  %v1264_v20 = vpop.f32.mrb[1].mxu1 }
 0x33b   : > { %v1194_v22 = vadd.f32 %v3315_v7, %v1193_v19  ;;  %v3458_v23 = vpop.f32.mrb[2].mxu0  ;;  %v3466_v24 = vpop.f32.mrb[2].mxu1  ;;  %v1265_v33 = vadd.f32 %v3320_v10, %v1264_v20 }
 0x33c   : > { %v1375_v25 = vmul.f32 %v4077_v11, %v1202_v17  ;;  %v1378_v26 = vmul.f32 %v4082_v12, %v1202_v17  ;;  %v1381_v27 = vmul.f32 %v4087_v13, %v1202_v17  ;;  %v1384_v28 = vmul.f32 %v4092_v14, %v1202_v17  ;;  %v1196_v29 = vpop.f32.mrb[3].mxu0  ;;  %v1267_v30 = vpop.f32.mrb[3].mxu1 }
 0x33d   : > { %v1414_v31 = vpack.c.bf16 %v1273_v18, %v1273_v18  ;;  %v1373_v32 = vmul.f32 %v4077_v11, %v1194_v22  ;;  %v1376_v38 = vmul.f32 %v4082_v12, %v1194_v22  ;;  %v1379_v39 = vmul.f32 %v4087_v13, %v1194_v22 }
 0x33e   : > { %v1386_v34 = vpack.c.bf16 %v1375_v25, %v1375_v25  ;;  %v1388_v35 = vpack.c.bf16 %v1378_v26, %v1378_v26  ;;  %v1390_v36 = vpack.c.bf16 %v1381_v27, %v1381_v27  ;;  %v1392_v37 = vpack.c.bf16 %v1384_v28, %v1384_v28 }
 0x33f   : > { %v1197_v40 = vadd.f32 %v3315_v7, %v1196_v29  ;;  %v1268_v41 = vadd.f32 %v3320_v10, %v1267_v30  ;;  %v4112_v45 = vsel %vm1068_vm3, %v1414_v31, 0  ;;  %v1382_v46 = vmul.f32 %v4092_v14, %v1194_v22 }
 0x340   : > { %v1446_v43 = vrot.slane %v1386_v34, %v4095_v21  ;;  %v1470_v44 = vrot.slane %v1388_v35, %v4095_v21  ;;  %v4120_v52 = vrot.slane %v1390_v36, %v4095_v21  ;;  %v4123_v53 = vrot.slane %v1392_v37, %v4095_v21 }
 0x341   : > { %v1374_v47 = vmul.f32 %v4077_v11, %v1197_v40  ;;  %v1377_v48 = vmul.f32 %v4082_v12, %v1197_v40  ;;  %v1380_v49 = vmul.f32 %v4087_v13, %v1197_v40  ;;  %v1383_v50 = vmul.f32 %v4092_v14, %v1197_v40  ;;  %v3473_v51 = vpop.f32.mrb[4].mxu0 }
 0x342   : > { %v1413_v54 = vpack.c.bf16 %v1268_v41, %v1265_v33  ;;  %v4125_v55 = vadd.f32 %v3473_v51, %v3325_v42  ;;  %v1335_v56 = vpop.f32.mrb[5].mxu0 }
 0x343   : > { %v1385_v57 = vpack.c.bf16 %v1374_v47, %v1373_v32  ;;  %v1387_v58 = vpack.c.bf16 %v1377_v48, %v1376_v38  ;;  %v1389_v59 = vpack.c.bf16 %v1380_v49, %v1379_v39  ;;  %v1391_v60 = vpack.c.bf16 %v1383_v50, %v1382_v46  ;;  %v3474_v61 = vpop.f32.mrb[6].mxu0 }
 0x344   : > { %v3334_v62 = vpack.c.bf16 %v1374_v47, %v1374_v47  ;;  %v3335_v63 = vpack.c.bf16 %v1377_v48, %v1377_v48  ;;  %v3336_v0 = vpack.c.bf16 %v1380_v49, %v1380_v49  ;;  %v3337_v1 = vpack.c.bf16 %v1383_v50, %v1383_v50  ;;  %v1338_v2 = vpop.f32.mrb[7].mxu0 }
 0x345   : > { %v1430_v4 = vrot.slane %v1385_v57, %v4095_v21  ;;  %v1454_v5 = vrot.slane %v1387_v58, %v4095_v21  ;;  %v1478_v6 = vrot.slane %v1389_v59, %v4095_v21  ;;  %v1502_v7 = vrot.slane %v1391_v60, %v4095_v21 }
 0x346   : > { %v1437_v8 = vrot.slane %v3334_v62, %v4095_v21  ;;  %v1461_v10 = vrot.slane %v3335_v63, %v4095_v21  ;;  %v1485_v15 = vrot.slane %v3336_v0, %v4095_v21  ;;  %v1509_v16 = vrot.slane %v3337_v1, %v4095_v21 }
 0x347   : > { %v1438_v17 = vcombine.high %v1430_v4, %v1430_v4  ;;  %v1336_v18 = vadd.f32 %v3325_v42, %v1335_v56  ;;  %v1620_v19 = vsel %vm1068_vm3, %v1413_v54, 0  ;;  %v1339_v20 = vadd.f32 %v3325_v42, %v1338_v2 }
 0x348   : > { %v1439_v22 = vcombine.high %v1437_v8, %v1437_v8  ;;  %3476 = vmatpush3.bf16.xpose.msra.mxu1 %v1620_v19  ;;  %v1395_v23 = vmul.f32 %v4077_v11, %v4125_v55  ;;  %v1462_v24 = vcombine.high %v1454_v5, %v1454_v5  ;;  %v1536_v25 = vcombine.low %v1446_v43, %v1454_v5 }
 0x349   : > { %v1519_v26 = vcombine.low %v1430_v4, %v1438_v17  ;;  %3477 = vmatprep.subr.bf16.mxu1 %v3772_v3  ;;  %v1393_v27 = vmul.f32 %v4077_v11, %v1336_v18  ;;  %v1394_v28 = vmul.f32 %v4077_v11, %v1339_v20  ;;  %v1396_v29 = vmul.f32 %v4082_v12, %v1336_v18 }
 0x34a   : > { %v1520_v30 = vcombine.low %v1437_v8, %v1439_v22  ;;  %v1406_v31 = vpack.c.bf16 %v1395_v23, %v1395_v23  ;;  %v1397_v32 = vmul.f32 %v4082_v12, %v1339_v20  ;;  %v1537_v33 = vcombine.low %v1462_v24, %v1461_v10 }
 0x34b   : > { %v1405_v34 = vpack.c.bf16 %v1394_v28, %v1393_v27  ;;  %v1527_v35 = vrot.slane %v1519_v26, %v4095_v21  ;;  %v1544_v36 = vrot.slane %v1536_v25, %v4095_v21  ;;  %v1463_v37 = vcombine.high %v1461_v10, %v1461_v10 }
 0x34c   : > { %v2370_v38 = vsel %vm2368_vm6, %v1406_v31, 0  ;;  %v1534_v39 = vrot.slane %v1520_v30, %v4095_v21  ;;  %v4147_v40 = vpack.c.bf16 %v1397_v32, %v1396_v29  ;;  %v1551_v11 = vrot.slane %v1537_v33, %v4095_v21 }
 0x34d   : > { %3499 = vmatprep.subr.bf16.mxu0 %v1405_v34  ;;  %v1486_v41 = vcombine.high %v1478_v6, %v1478_v6  ;;  %v1553_v42 = vcombine.low %v1463_v37, %v1470_v44  ;;  %v1487_v43 = vcombine.high %v1485_v15, %v1485_v15  ;;  %v1571_v46 = vcombine.low %v4120_v52, %v1502_v7 }
 0x34e   : > { %3500 = vmatpush3.bf16.msra.mxu0 %v1405_v34  ;;  %v1535_v47 = vcombine.low %v1527_v35, %v1534_v39  ;;  %v1552_v48 = vcombine.low %v1544_v36, %v1551_v11  ;;  %v1510_v49 = vcombine.high %v1502_v7, %v1502_v7  ;;  %v1511_v50 = vcombine.high %v1509_v16, %v1509_v16 }
 0x34f   : > { %3567 = vmatprep.subr.msk.bf16.mxu0 %vm2368_vm6, %v1406_v31  ;;  %v1554_v51 = vcombine.low %v1478_v6, %v1486_v41  ;;  %v1561_v54 = vrot.slane %v1553_v42, %v4095_v21  ;;  %v1570_v56 = vcombine.low %v1485_v15, %v1487_v43  ;;  %v1585_v57 = vrot.slane %v1571_v46, %v4095_v21 }
 0x350   : > { %3478 = vmatpush3.bf16.xpose.msra.mxu1 %v4112_v45  ;;  %v1587_v58 = vcombine.low %v1510_v49, %v1509_v16  ;;  %v1588_v44 = vcombine.low %v1511_v50, %v4123_v53  ;;  %v4158_v52 = vmul.f32 %v4082_v12, %v4125_v55  ;;  %v1399_v59 = vmul.f32 %v4087_v13, %v1336_v18 }
 0x351   : > { %v1568_v60 = vrot.slane %v1554_v51, %v4095_v21  ;;  %v1578_v61 = vrot.slane %v1570_v56, %v4095_v21  ;;  %v1400_v62 = vmul.f32 %v4087_v13, %v1339_v20  ;;  %v4166_v63 = vmul.f32 %v4087_v13, %v4125_v55 }
 0x352   : > { %3502 = vmatpush3.bf16.msra.mxu0 %v2370_v38  ;;  %v1595_v45 = vrot.slane %v1587_v58, %v4095_v21  ;;  %v1602_v53 = vrot.slane %v1588_v44, %v4095_v21  ;;  %v1402_v12 = vmul.f32 %v4092_v14, %v1336_v18  ;;  %v1403_v5 = vmul.f32 %v4092_v14, %v1339_v20 }
 0x353   : > { %3507 = vmatprep.subr.bf16.mxu0 %v4147_v40  ;;  %v1569_v0 = vcombine.low %v1561_v54, %v1568_v60  ;;  %v1586_v1 = vcombine.low %v1578_v61, %v1585_v57  ;;  %v4172_v2 = vpack.c.bf16 %v1400_v62, %v1399_v59  ;;  %v4177_v13 = vmul.f32 %v4092_v14, %v4125_v55 }
 0x354   : > { %v1603_v4 = vcombine.low %v1595_v45, %v1602_v53  ;;  %v4179_v6 = vpack.c.bf16 %v1403_v5, %v1402_v12 }
 0x357   : > { %3480 = vmatmul.mubr.msk.bf16.vlgmr.msra.gmra.mrb[4].mxu1 %vm1068_vm3, %v1535_v47 }
 0x358   : > { %3483 = vmatprep.mubr.msk.bf16.mxu1 %vm3773_vm5, %v3772_v3 }
 0x35f   : > { %3484 = vmatmul.mubr.msk.bf16.gmra.mrb[8].mxu1 %vm1068_vm3, %v1552_v48 }
 0x360   : > { %3487 = vmatprep.mubr.msk.bf16.mxu1 %vm3773_vm5, %v3772_v3 }
 0x367   : > { %3488 = vmatmul.mubr.msk.bf16.gmra.mrb[12].mxu1 %vm1068_vm3, %v1569_v0 }
 0x368   : > { %3491 = vmatprep.mubr.msk.bf16.mxu1 %vm3773_vm5, %v3772_v3 }
 0x36f   : > { %3492 = vmatmul.mubr.msk.bf16.gmra.mrb[16].mxu1 %vm1068_vm3, %v1586_v1 }
 0x370   : > { %3495 = vmatprep.mubr.msk.bf16.mxu1 %vm3773_vm5, %v3772_v3 }
 0x377   : > { %3496 = vmatmul.mubr.msk.bf16.gmra.mrb[20].mxu1 %vm1068_vm3, %v1603_v4 }
 0x42a   : > { %v1659_v14 = vpop.f32.mrb[4].mxu1 }
 0x42b   : > { %v1708_v21 = vcombine.high %v1659_v14, %v1659_v14  ;;  %v3481_v55 = vpop.f32.mrb[5].mxu1  ;;  %v4194_v8 = vmul.f32 0.35355338, %v1659_v14 }
 0x42c   : > { %v1662_v7 = vpop.f32.mrb[6].mxu1 }
 0x42d   : > { %v4196_v10 = vmul.f32 0.35355338, %v1708_v21  ;;  %v1709_v15 = vcombine.high %v1662_v7, %v1662_v7  ;;  %v3482_v16 = vpop.f32.mrb[7].mxu1  ;;  %v4198_v17 = vmul.f32 0.35355338, %v1662_v7 }
 0x42f   : > { %v4200_v18 = vmul.f32 0.35355338, %v1709_v15  ;;  %v1764_v3 = vcombine.low %v4194_v8, %v4196_v10 }
 0x431   : > { %v1781_v19 = vsel %vm1780_vm7, %v1764_v3, -inf  ;;  %v1765_v20 = vcombine.low %v4198_v17, %v4200_v18 }
 0x432   : > { %1782 = vmax.xlane.f32.xlu0 %v1781_v19  ;;  %v1667_v22 = vpop.f32.mrb[8].mxu1 }
 0x433   : > { %v1710_v23 = vcombine.high %v1667_v22, %v1667_v22  ;;  %v4207_v24 = vmul.f32 0.35355338, %v1667_v22  ;;  %v3485_v25 = vpop.f32.mrb[9].mxu1  ;;  %v1784_v26 = vsel %vm1780_vm7, %v1765_v20, -inf }
 0x434   : > { %1785 = vmax.xlane.f32.xlu1 %v1784_v26  ;;  %v1670_v27 = vpop.f32.mrb[10].mxu1 }
 0x435   : > { %v4210_v28 = vmul.f32 0.35355338, %v1710_v23  ;;  %v4212_v29 = vmul.f32 0.35355338, %v1670_v27  ;;  %v3486_v30 = vpop.f32.mrb[11].mxu1  ;;  %v1788_v31 = vsel %vm1787_vm8, %v4207_v24, -inf  ;;  %v1711_v32 = vcombine.high %v1670_v27, %v1670_v27 }
 0x436   : > { %1789 = vmax.xlane.f32.xlu0 %v1788_v31  ;;  %v3775_v27 = vmov 839922192   ;;  %v3776_v31 = vmov 1985246804  }
 0x437   : > { %v1766_v33 = vcombine.low %v4210_v28, %v4212_v29  ;;  %v4219_v36 = vmul.f32 0.35355338, %v1711_v32  ;;  %v1831_v30 = vunpack.c.l.s4 %v3775_v27  ;;  %v1838_v32 = vunpack.c.l.s4 %v3776_v31 }
 0x439   : > { %v1791_v34 = vsel %vm1780_vm7, %v1766_v33, -inf  ;;  %v1832_v33 = vunpack.c.0.s8 %v1831_v30 }
 0x43a   : > { %1792 = vmax.xlane.f32.xlu1 %v1791_v34  ;;  %v1675_v35 = vpop.f32.mrb[12].mxu1  ;;  %v1839_v34 = vunpack.c.0.s8 %v1838_v32 }
 0x43b   : > { %v1712_v37 = vcombine.high %v1675_v35, %v1675_v35  ;;  %v4221_v38 = vmul.f32 0.35355338, %v1675_v35  ;;  %v3489_v39 = vpop.f32.mrb[13].mxu1  ;;  %v4267_v35 = vsub.s32 %v1832_v33, %v4067_v9 }
 0x43c   : > { %v1678_v11 = vpop.f32.mrb[14].mxu1 }
 0x43d   : > { %v4223_v41 = vmul.f32 0.35355338, %v1712_v37  ;;  %v1713_v42 = vcombine.high %v1678_v11, %v1678_v11  ;;  %v3490_v43 = vpop.f32.mrb[15].mxu1  ;;  %v1767_v46 = vcombine.low %v4219_v36, %v4221_v38  ;;  %v4227_v47 = vmul.f32 0.35355338, %v1678_v11 }
 0x43e   : > { %v4270_v37 = vsub.s32 %v1839_v34, %v4067_v9 }
 0x43f   : > { %v4229_v48 = vmul.f32 0.35355338, %v1713_v42  ;;  %v1794_v49 = vsel %vm1780_vm7, %v1767_v46, -inf  ;;  %v1797_v50 = vsel %vm1787_vm8, %v4223_v41, -inf }
 0x440   : > { %1795 = vmax.xlane.f32.xlu0 %v1794_v49  ;;  %1798 = vmax.xlane.f32.xlu1 %v1797_v50 }
 0x441   : > { %v1768_v51 = vcombine.low %v4227_v47, %v4229_v48 }
 0x442   : > { %v1683_v54 = vpop.f32.mrb[16].mxu1 }
 0x443   : > { %v1714_v56 = vcombine.high %v1683_v54, %v1683_v54  ;;  %v3493_v57 = vpop.f32.mrb[17].mxu1  ;;  %v1800_v58 = vsel %vm1780_vm7, %v1768_v51, -inf  ;;  %v4237_v44 = vmul.f32 0.35355338, %v1683_v54 }
 0x444   : > { %1801 = vmax.xlane.f32.xlu0 %v1800_v58  ;;  %v1686_v59 = vpop.f32.mrb[18].mxu1 }
 0x445   : > { %v4239_v60 = vmul.f32 0.35355338, %v1714_v56  ;;  %v4241_v61 = vmul.f32 0.35355338, %v1686_v59  ;;  %v3494_v62 = vpop.f32.mrb[19].mxu1  ;;  %v1715_v45 = vcombine.high %v1686_v59, %v1686_v59 }
 0x447   : > { %v1806_v53 = vsel %vm1787_vm8, %v4241_v61, -inf  ;;  %v1769_v12 = vcombine.low %v4237_v44, %v4239_v60  ;;  %v4248_v4 = vmul.f32 0.35355338, %v1715_v45 }
 0x448   : > { %1807 = vmax.xlane.f32.xlu0 %v1806_v53 }
 0x449   : > { %v1803_v0 = vsel %vm1780_vm7, %v1769_v12, -inf }
 0x44a   : > { %1804 = vmax.xlane.f32.xlu1 %v1803_v0  ;;  %v1691_v1 = vpop.f32.mrb[20].mxu1 }
 0x44b   : > { %v1716_v5 = vcombine.high %v1691_v1, %v1691_v1  ;;  %v4250_v14 = vmul.f32 0.35355338, %v1691_v1  ;;  %v3497_v21 = vpop.f32.mrb[21].mxu1 }
 0x44c   : > { %v1694_v55 = vpop.f32.mrb[22].mxu1 }
 0x44d   : > { %v4252_v7 = vmul.f32 0.35355338, %v1716_v5  ;;  %v1717_v15 = vcombine.high %v1694_v55, %v1694_v55  ;;  %v4254_v16 = vmul.f32 0.35355338, %v1694_v55  ;;  %v3498_v3 = vpop.f32.mrb[23].mxu1  ;;  %v1770_v19 = vcombine.low %v4248_v4, %v4250_v14 }
 0x44f   : > { %v4258_v20 = vmul.f32 0.35355338, %v1717_v15  ;;  %v1809_v22 = vsel %vm1780_vm7, %v1770_v19, -inf  ;;  %v1771_v23 = vcombine.low %v4252_v7, %v4254_v16 }
 0x450   : > { %1810 = vmax.xlane.f32.xlu1 %v1809_v22 }
 0x451   : > { %v1812_v25 = vsel %vm1780_vm7, %v1771_v23, -inf  ;;  %v1815_v26 = vsel %vm1787_vm8, %v4258_v20, -inf }
 0x452   : > { %1813 = vmax.xlane.f32.xlu0 %v1812_v25 }
 0x454   : > { %1816 = vmax.xlane.f32.xlu1 %v1815_v26 }
 0x4bf   : > { %v1783_v39 = vpop.xlane.xlu0 %1782 }
 0x4c0   : > { %v1836_v11 = vrot.slane %v1783_v39, %v4267_v35  ;;  %v1843_v42 = vrot.slane %v1783_v39, %v4270_v37 }
 0x4c1   : > { %v1786_v43 = vpop.xlane.xlu1 %1785 }
 0x4c2   : > { %v1990_v46 = vsub.f32 %v4194_v8, %v1836_v11  ;;  %v1991_v49 = vsub.f32 %v4196_v10, %v1843_v42  ;;  %v1850_v50 = vrot.slane %v1786_v43, %v4267_v35  ;;  %v1857_v51 = vrot.slane %v1786_v43, %v4270_v37 }
 0x4c3   : > { %v1790_v54 = vpop.xlane.xlu0 %1789 }
 0x4c4   : > { %v2010_v56 = vmul.f32 1.442695, %v1990_v46  ;;  %v2012_v57 = vmul.f32 1.442695, %v1991_v49  ;;  %v1992_v9 = vsub.f32 %v4198_v17, %v1850_v50  ;;  %v1993_v58 = vsub.f32 %v4200_v18, %v1857_v51 }
 0x4c5   : > { %v1864_v59 = vrot.slane %v1790_v54, %v4267_v35 }
 0x4c6   : > { %3647 = vpow2.f32 %v2010_v56  ;;  %v2014_v62 = vmul.f32 1.442695, %v1992_v9  ;;  %v2016_v45 = vmul.f32 1.442695, %v1993_v58 }
 0x4c7   : > { %3649 = vpow2.f32 %v2012_v57  ;;  %v1994_v8 = vsub.f32 %v4207_v24, %v1864_v59  ;;  %v1793_v10 = vpop.xlane.xlu1 %1792 }
 0x4c8   : > { %3651 = vpow2.f32 %v2014_v62  ;;  %v1871_v53 = vrot.slane %v1793_v10, %v4267_v35  ;;  %v1878_v12 = vrot.slane %v1793_v10, %v4270_v37 }
 0x4c9   : > { %3653 = vpow2.f32 %v2016_v45  ;;  %v2018_v0 = vmul.f32 1.442695, %v1994_v8 }
 0x4ca   : > { %v1995_v17 = vsub.f32 %v4210_v28, %v1871_v53  ;;  %v1996_v18 = vsub.f32 %v4212_v29, %v1878_v12 }
 0x4cb   : > { %3655 = vpow2.f32 %v2018_v0 }
 0x4cc   : > { %v2020_v1 = vmul.f32 1.442695, %v1995_v17  ;;  %v2022_v5 = vmul.f32 1.442695, %v1996_v18 }
 0x4cd   : > { %v1796_v21 = vpop.xlane.xlu0 %1795  ;;  %v1799_v55 = vpop.xlane.xlu1 %1798 }
 0x4ce   : > { %3657 = vpow2.f32 %v2020_v1  ;;  %v1885_v24 = vrot.slane %v1796_v21, %v4267_v35  ;;  %v1892_v15 = vrot.slane %v1796_v21, %v4270_v37  ;;  %v1899_v3 = vrot.slane %v1799_v55, %v4267_v35 }
 0x4cf   : > { %3659 = vpow2.f32 %v2022_v5 }
 0x4d0   : > { %v4289_v19 = vpop.eup %3647  ;;  %v1997_v22 = vsub.f32 %v4219_v36, %v1885_v24  ;;  %v1998_v28 = vsub.f32 %v4221_v38, %v1892_v15  ;;  %v1999_v29 = vsub.f32 %v4223_v41, %v1899_v3 }
 0x4d1   : > { %v4294_v23 = vpop.eup %3649  ;;  %v1802_v25 = vpop.xlane.xlu0 %1801 }
 0x4d2   : > { %v4296_v26 = vpop.eup %3651  ;;  %v2024_v27 = vmul.f32 1.442695, %v1997_v22  ;;  %v2026_v30 = vmul.f32 1.442695, %v1998_v28  ;;  %v2028_v31 = vmul.f32 1.442695, %v1999_v29  ;;  %v1906_v32 = vrot.slane %v1802_v25, %v4267_v35 }
 0x4d3   : > { %v4299_v33 = vpop.eup %3653  ;;  %v1913_v34 = vrot.slane %v1802_v25, %v4270_v37  ;;  %v2066_v36 = vcombine.low %v4289_v19, %v4294_v23 }
 0x4d4   : > { %3661 = vpow2.f32 %v2024_v27  ;;  %v2000_v38 = vsub.f32 %v4227_v47, %v1906_v32  ;;  %v2067_v41 = vcombine.low %v4296_v26, %v4299_v33 }
 0x4d5   : > { %3663 = vpow2.f32 %v2026_v30  ;;  %v2001_v39 = vsub.f32 %v4229_v48, %v1913_v34  ;;  %v2082_v11 = vsel %vm1780_vm7, %v2066_v36, 0.0  ;;  %v1808_v42 = vpop.xlane.xlu0 %1807  ;;  %v4309_v43 = vpop.eup %3655 }
 0x4d6   : > { %3665 = vpow2.f32 %v2028_v31  ;;  %v2030_v46 = vmul.f32 1.442695, %v2000_v38  ;;  %2083 = vadd.xlane.f32.xlu0 %v2082_v11  ;;  %v1934_v49 = vrot.slane %v1808_v42, %v4267_v35  ;;  %v2085_v50 = vsel %vm1780_vm7, %v2067_v41, 0.0 }
 0x4d7   : > { %v2032_v51 = vmul.f32 1.442695, %v2001_v39  ;;  %2086 = vadd.xlane.f32.xlu1 %v2085_v50  ;;  %v1805_v47 = vpop.xlane.xlu1 %1804  ;;  %v2088_v58 = vsel %vm1787_vm8, %v4309_v43, 0.0 }
 0x4d8   : > { %v4313_v54 = vpop.eup %3657  ;;  %3667 = vpow2.f32 %v2030_v46  ;;  %v2004_v48 = vsub.f32 %v4241_v61, %v1934_v49  ;;  %v1920_v56 = vrot.slane %v1805_v47, %v4267_v35  ;;  %v1927_v57 = vrot.slane %v1805_v47, %v4270_v37 }
 0x4d9   : > { %v4318_v9 = vpop.eup %3659  ;;  %3669 = vpow2.f32 %v2032_v51 }
 0x4da   : > { %v2038_v59 = vmul.f32 1.442695, %v2004_v48  ;;  %v2002_v62 = vsub.f32 %v4237_v44, %v1920_v56  ;;  %v2003_v45 = vsub.f32 %v4239_v60, %v1927_v57  ;;  %2089 = vadd.xlane.f32.xlu0 %v2088_v58  ;;  %v2068_v8 = vcombine.low %v4313_v54, %v4318_v9 }
 0x4dc   : > { %v2034_v61 = vmul.f32 1.442695, %v2002_v62  ;;  %v2036_v10 = vmul.f32 1.442695, %v2003_v45  ;;  %v2091_v53 = vsel %vm1780_vm7, %v2068_v8, 0.0  ;;  %3671 = vpow2.f32 %v2038_v59 }
 0x4dd   : > { %2092 = vadd.xlane.f32.xlu1 %v2091_v53  ;;  %v1811_v12 = vpop.xlane.xlu1 %1810 }
 0x4de   : > { %v4327_v0 = vpop.eup %3661  ;;  %3673 = vpow2.f32 %v2034_v61  ;;  %v1941_v17 = vrot.slane %v1811_v12, %v4267_v35  ;;  %v1948_v44 = vrot.slane %v1811_v12, %v4270_v37 }
 0x4df   : > { %v4331_v18 = vpop.eup %3663  ;;  %3675 = vpow2.f32 %v2036_v10  ;;  %v1814_v60 = vpop.xlane.xlu0 %1813 }
 0x4e0   : > { %v4333_v1 = vpop.eup %3665  ;;  %v2005_v5 = vsub.f32 %v4248_v4, %v1941_v17  ;;  %v2006_v21 = vsub.f32 %v4250_v14, %v1948_v44  ;;  %v1955_v55 = vrot.slane %v1814_v60, %v4267_v35  ;;  %v1962_v24 = vrot.slane %v1814_v60, %v4270_v37 }
 0x4e1   : > { %v2097_v15 = vsel %vm1787_vm8, %v4333_v1, 0.0  ;;  %v1817_v3 = vpop.xlane.xlu1 %1816  ;;  %v2069_v22 = vcombine.low %v4327_v0, %v4331_v18 }
 0x4e2   : > { %v4343_v28 = vpop.eup %3667  ;;  %v2040_v29 = vmul.f32 1.442695, %v2005_v5  ;;  %v2042_v25 = vmul.f32 1.442695, %v2006_v21  ;;  %v2007_v27 = vsub.f32 %v4252_v7, %v1955_v55  ;;  %v2008_v4 = vsub.f32 %v4254_v16, %v1962_v24  ;;  %2098 = vadd.xlane.f32.xlu1 %v2097_v15 }
 0x4e3   : > { %v4347_v14 = vpop.eup %3669  ;;  %v1969_v30 = vrot.slane %v1817_v3, %v4267_v35  ;;  %v2094_v31 = vsel %vm1780_vm7, %v2069_v22, 0.0 }
 0x4e4   : > { %3677 = vpow2.f32 %v2040_v29  ;;  %v2044_v32 = vmul.f32 1.442695, %v2007_v27  ;;  %v2046_v34 = vmul.f32 1.442695, %v2008_v4  ;;  %2095 = vadd.xlane.f32.xlu0 %v2094_v31  ;;  %v2070_v36 = vcombine.low %v4343_v28, %v4347_v14 }
 0x4e5   : > { %3679 = vpow2.f32 %v2042_v25  ;;  %v2009_v38 = vsub.f32 %v4258_v20, %v1969_v30 }
 0x4e6   : > { %3681 = vpow2.f32 %v2044_v32  ;;  %v2100_v7 = vsel %vm1780_vm7, %v2070_v36, 0.0  ;;  %v4355_v16 = vpop.eup %3671 }
 0x4e7   : > { %3683 = vpow2.f32 %v2046_v34  ;;  %v2048_v41 = vmul.f32 1.442695, %v2009_v38  ;;  %v2106_v46 = vsel %vm1787_vm8, %v4355_v16, 0.0 }
 0x4e8   : > { %v4357_v39 = vpop.eup %3673  ;;  %2101 = vadd.xlane.f32.xlu0 %v2100_v7 }
 0x4e9   : > { %v4359_v11 = vpop.eup %3675  ;;  %3685 = vpow2.f32 %v2048_v41 }
 0x4ea   : > { %v2071_v42 = vcombine.low %v4357_v39, %v4359_v11 }
 0x4ec   : > { %2107 = vadd.xlane.f32.xlu0 %v2106_v46  ;;  %v2103_v20 = vsel %vm1780_vm7, %v2071_v42, 0.0 }
 0x4ed   : > { %2104 = vadd.xlane.f32.xlu1 %v2103_v20 }
 0x4ee   : > { %v4366_v49 = vpop.eup %3677 }
 0x4ef   : > { %v4368_v50 = vpop.eup %3679 }
 0x4f0   : > { %v4370_v51 = vpop.eup %3681  ;;  %v2072_v47 = vcombine.low %v4366_v49, %v4368_v50 }
 0x4f1   : > { %v4374_v48 = vpop.eup %3683 }
 0x4f2   : > { %v2109_v56 = vsel %vm1780_vm7, %v2072_v47, 0.0  ;;  %v2073_v57 = vcombine.low %v4370_v51, %v4374_v48 }
 0x4f3   : > { %v4379_v58 = vpop.eup %3685  ;;  %2110 = vadd.xlane.f32.xlu1 %v2109_v56 }
 0x4f4   : > { %v2112_v59 = vsel %vm1780_vm7, %v2073_v57, 0.0  ;;  %v2115_v62 = vsel %vm1787_vm8, %v4379_v58, 0.0 }
 0x4f5   : > { %2113 = vadd.xlane.f32.xlu0 %v2112_v59 }
 0x4f7   : > { %2116 = vadd.xlane.f32.xlu1 %v2115_v62 }
 0x563   : > { %v2084_v45 = vpop.xlane.xlu0 %2083 }
 0x564   : > { %3687 = vrcp.f32 %v2084_v45  ;;  %v2087_v8 = vpop.xlane.xlu1 %2086 }
 0x565   : > { %3689 = vrcp.f32 %v2087_v8 }
 0x567   : > { %v2090_v61 = vpop.xlane.xlu0 %2089 }
 0x568   : > { %3691 = vrcp.f32 %v2090_v61 }
 0x56a   : > { %v2093_v10 = vpop.xlane.xlu1 %2092 }
 0x56b   : > { %3693 = vrcp.f32 %v2093_v10 }
 0x56e   : > { %v3688_v53 = vpop.eup %3687 }
 0x56f   : > { %v3690_v12 = vpop.eup %3689  ;;  %v2148_v17 = vrot.slane %v3688_v53, %v4267_v35  ;;  %v2155_v44 = vrot.slane %v3688_v53, %v4270_v37  ;;  %v2099_v60 = vpop.xlane.xlu1 %2098 }
 0x570   : > { %v2162_v5 = vrot.slane %v3690_v12, %v4267_v35  ;;  %v2169_v21 = vrot.slane %v3690_v12, %v4270_v37  ;;  %3695 = vrcp.f32 %v2099_v60 }
 0x571   : > { %v2096_v55 = vpop.xlane.xlu0 %2095  ;;  %v2302_v24 = vmul.f32 %v4289_v19, %v2148_v17  ;;  %v2303_v15 = vmul.f32 %v4294_v23, %v2155_v44  ;;  %v1408_v19 = vpack.c.bf16 %v4158_v52, %v4158_v52 }
 0x572   : > { %v3692_v3 = vpop.eup %3691  ;;  %3697 = vrcp.f32 %v2096_v55  ;;  %v2304_v22 = vmul.f32 %v4296_v26, %v2162_v5  ;;  %v2305_v29 = vmul.f32 %v4299_v33, %v2169_v21 }
 0x573   : > { %v2176_v25 = vrot.slane %v3692_v3, %v4267_v35  ;;  %v2338_v27 = vcombine.low %v2302_v24, %v2303_v15  ;;  %v2427_v52 = vsel %vm2368_vm6, %v1408_v19, 0 }
 0x574   : > { %v2339_v4 = vcombine.low %v2304_v22, %v2305_v29 }
 0x575   : > { %v2102_v30 = vpop.xlane.xlu0 %2101  ;;  %v2306_v31 = vmul.f32 %v4309_v43, %v2176_v25  ;;  %v3694_v32 = vpop.eup %3693 }
 0x576   : > { %3699 = vrcp.f32 %v2102_v30  ;;  %v2354_v34 = vpack.c.bf16 %v2339_v4, %v2338_v27  ;;  %v2183_v23 = vrot.slane %v3694_v32, %v4267_v35  ;;  %v2190_v26 = vrot.slane %v3694_v32, %v4270_v37 }
 0x577   : > { %v2355_v36 = vpack.c.bf16 %v2306_v31, %v2306_v31  ;;  %v1412_v31 = vpack.c.bf16 %v4177_v13, %v4177_v13 }
 0x578   : > { %3503 = vmatprep.mubr.msk.bf16.mxu0 %vm1780_vm7, %v2354_v34  ;;  %v2307_v20 = vmul.f32 %v4313_v54, %v2183_v23  ;;  %v2308_v47 = vmul.f32 %v4318_v9, %v2190_v26 }
 0x579   : > { %v2108_v33 = vpop.xlane.xlu0 %2107  ;;  %3504 = vmatmul.mubr.msk.bf16.vlgmr.msra.gmra.mrb[8].mxu0 %vm1780_vm7, %v2355_v36 }
 0x57a   : > { %v3696_v38 = vpop.eup %3695  ;;  %3701 = vrcp.f32 %v2108_v33  ;;  %3508 = vmatpush3.bf16.msra.mxu0 %v4147_v40  ;;  %v2105_v43 = vpop.xlane.xlu1 %2104  ;;  %v2340_v45 = vcombine.low %v2307_v20, %v2308_v47 }
 0x57b   : > { %3568 = vmatprep.subr.msk.bf16.mxu0 %vm2368_vm6, %v1408_v19  ;;  %3703 = vrcp.f32 %v2105_v43  ;;  %v2211_v41 = vrot.slane %v3696_v38, %v4267_v35  ;;  %v2541_v19 = vsel %vm2368_vm6, %v1412_v31, 0 }
 0x57c   : > { %v3698_v7 = vpop.eup %3697 }
 0x57d   : > { %v2197_v42 = vrot.slane %v3698_v7, %v4267_v35  ;;  %v2204_v46 = vrot.slane %v3698_v7, %v4270_v37  ;;  %v2311_v62 = vmul.f32 %v4333_v1, %v2211_v41  ;;  %v1410_v1 = vpack.c.bf16 %v4166_v63, %v4166_v63 }
 0x57e   : > { %3510 = vmatpush3.bf16.msra.mxu0 %v2427_v52 }
 0x57f   : > { %3515 = vmatprep.subr.bf16.mxu0 %v4172_v2  ;;  %v2309_v40 = vmul.f32 %v4327_v0, %v2197_v42  ;;  %v2310_v56 = vmul.f32 %v4331_v18, %v2204_v46  ;;  %v2357_v17 = vpack.c.bf16 %v2311_v62, %v2311_v62  ;;  %v2484_v15 = vsel %vm2368_vm6, %v1410_v1, 0 }
 0x580   : > { %v3700_v57 = vpop.eup %3699  ;;  %v2111_v59 = vpop.xlane.xlu1 %2110 }
 0x581   : > { %3705 = vrcp.f32 %v2111_v59  ;;  %v2341_v8 = vcombine.low %v2309_v40, %v2310_v56  ;;  %v2218_v61 = vrot.slane %v3700_v57, %v4267_v35  ;;  %v2225_v54 = vrot.slane %v3700_v57, %v4270_v37 }
 0x582   : > { %v2114_v10 = vpop.xlane.xlu0 %2113 }
 0x583   : > { %3707 = vrcp.f32 %v2114_v10  ;;  %v2356_v9 = vpack.c.bf16 %v2341_v8, %v2340_v45  ;;  %v2312_v5 = vmul.f32 %v4343_v28, %v2218_v61  ;;  %v2313_v21 = vmul.f32 %v4347_v14, %v2225_v54 }
 0x584   : > { %v3702_v53 = vpop.eup %3701  ;;  %v2117_v12 = vpop.xlane.xlu1 %2116 }
 0x585   : > { %v3704_v0 = vpop.eup %3703  ;;  %v2246_v18 = vrot.slane %v3702_v53, %v4267_v35  ;;  %3511 = vmatprep.mubr.msk.bf16.mxu0 %vm1780_vm7, %v2356_v9  ;;  %3709 = vrcp.f32 %v2117_v12  ;;  %v2342_v3 = vcombine.low %v2312_v5, %v2313_v21 }
 0x586   : > { %v2232_v44 = vrot.slane %v3704_v0, %v4267_v35  ;;  %v2239_v60 = vrot.slane %v3704_v0, %v4270_v37  ;;  %3512 = vmatmul.mubr.msk.bf16.vlgmr.msra.gmra.mrb[12].mxu0 %vm1780_vm7, %v2357_v17 }
 0x587   : > { %3516 = vmatpush3.bf16.msra.mxu0 %v4172_v2  ;;  %v2316_v63 = vmul.f32 %v4355_v16, %v2246_v18 }
 0x588   : > { %3569 = vmatprep.subr.msk.bf16.mxu0 %vm2368_vm6, %v1410_v1  ;;  %v2314_v55 = vmul.f32 %v4357_v39, %v2232_v44  ;;  %v2315_v24 = vmul.f32 %v4359_v11, %v2239_v60 }
 0x589   : > { %v2359_v27 = vpack.c.bf16 %v2316_v63, %v2316_v63 }
 0x58a   : > { %v2343_v22 = vcombine.low %v2314_v55, %v2315_v24 }
 0x58b   : > { %v3706_v29 = vpop.eup %3705  ;;  %3518 = vmatpush3.bf16.msra.mxu0 %v2484_v15 }
 0x58c   : > { %v2253_v28 = vrot.slane %v3706_v29, %v4267_v35  ;;  %v2260_v14 = vrot.slane %v3706_v29, %v4270_v37  ;;  %3523 = vmatprep.subr.bf16.mxu0 %v4179_v6  ;;  %v2358_v2 = vpack.c.bf16 %v2343_v22, %v2342_v3  ;;  %v3355_v22 = vld [vmem:[%s4645_s12] ss:$0 sm:$0xff] }
 0x58d   : > { %v3708_v25 = vpop.eup %3707 }
 0x58e   : > { %v2267_v39 = vrot.slane %v3708_v25, %v4267_v35  ;;  %v2274_v11 = vrot.slane %v3708_v25, %v4270_v37  ;;  %3519 = vmatprep.mubr.msk.bf16.mxu0 %vm1780_vm7, %v2358_v2  ;;  %v2317_v16 = vmul.f32 %v4366_v49, %v2253_v28  ;;  %v2318_v4 = vmul.f32 %v4368_v50, %v2260_v14  ;;  %v3723_v28 = vld [vmem:[#allocation2 + $0x10] sm:$0xf]  ;;  %v3724_v2 = vld [vmem:[#allocation2] sm:$0xff] }
 0x58f   : > { %v3710_v30 = vpop.eup %3709  ;;  %3520 = vmatmul.mubr.msk.bf16.vlgmr.msra.gmra.mrb[16].mxu0 %vm1780_vm7, %v2359_v27 }
 0x590   : > { %v2281_v32 = vrot.slane %v3710_v30, %v4267_v35  ;;  %3524 = vmatpush3.bf16.msra.mxu0 %v4179_v6  ;;  %v2319_v37 = vmul.f32 %v4370_v51, %v2267_v39  ;;  %v2320_v34 = vmul.f32 %v4374_v48, %v2274_v11  ;;  %v2344_v49 = vcombine.low %v2317_v16, %v2318_v4  ;;  %v3629_v6 = vld [vmem:[%s3972_s25] sm:$0xff]   ;;  %v3630_v35 = vld [vmem:[%s3972_s25 + $0x8] sm:$0xff]   ;;  %s4653_s25 = sld [smem:[#allocation26_spill]] (!%p3372_p8) }
 0x591   : > { %3570 = vmatprep.subr.msk.bf16.mxu0 %vm2368_vm6, %v1412_v31  ;;  %v3725_v16 = vld [vmem:[#allocation2 + $0x8] sm:$0xff] }
 0x592   : > { %v2345_v50 = vcombine.low %v2319_v37, %v2320_v34  ;;  %v2321_v36 = vmul.f32 %v4379_v58, %v2281_v32 }
 0x594   : > { %3526 = vmatpush3.bf16.msra.mxu0 %v2541_v19  ;;  %v2360_v23 = vpack.c.bf16 %v2345_v50, %v2344_v49  ;;  %v2361_v13 = vpack.c.bf16 %v2321_v36, %v2321_v36 }
 0x595   : > { %3531 = vmatprep.subr.bf16.mxu0 %v3629_v6 }
 0x596   : > { %3527 = vmatprep.mubr.msk.bf16.mxu0 %vm1780_vm7, %v2360_v23 }
 0x597   : > { %3528 = vmatmul.mubr.msk.bf16.vlgmr.msra.gmra.mrb[20].mxu0 %vm1780_vm7, %v2361_v13 }
 0x598   : > { %3532 = vmatpush3.bf16.msra.mxu0 %v3629_v6 }
 0x599   : > { %3533 = vmatprep.subr.bf16.mxu0 %v3630_v35 }
 0x59c   : > { %3534 = vmatpush3.bf16.msra.mxu0 %v3630_v35 }
 0x64c   : > { %v3505_v51 = vpop.f32.mrb[8].mxu0 }
 0x64d   : > { %v2406_v48 = vpop.f32.mrb[9].mxu0  ;;  %v2605_v38 = vsel %vm1075_vm4, %v3505_v51, 0.0 }
 0x64e   : > { %v3506_v26 = vpop.f32.mrb[10].mxu0  ;;  %v2591_v41 = vsel %vm1068_vm3, %v2406_v48, 0.0 }
 0x64f   : > { %v2409_v33 = vpop.f32.mrb[11].mxu0 }
 0x650   : > { %v2598_v40 = vsel %vm1068_vm3, %v2409_v33, 0.0 }
 0x659   : > { %v3513_v58 = vpop.f32.mrb[12].mxu0 }
 0x65a   : > { %v2606_v43 = vsel %vm1075_vm4, %v3513_v58, 0.0  ;;  %v2463_v7 = vpop.f32.mrb[13].mxu0 }
 0x65b   : > { %v2607_v52 = vadd.f32 %v2606_v43, %v2605_v38  ;;  %v2592_v42 = vsel %vm1068_vm3, %v2463_v7, 0.0  ;;  %v3514_v46 = vpop.f32.mrb[14].mxu0  ;;  %v3631_v7 = vld [vmem:[%s3989_s22] sm:$0xff]  }
 0x65c   : > { %v2593_v20 = vadd.f32 %v2592_v42, %v2591_v41  ;;  %v2466_v47 = vpop.f32.mrb[15].mxu0  ;;  %v3632_v41 = vld [vmem:[%s3989_s22 + $0x8] sm:$0xff]   ;;  %3539 = vmatprep.subr.bf16.mxu0 %v3631_v7 }
 0x65d   : > { %v2599_v56 = vsel %vm1068_vm3, %v2466_v47, 0.0 }
 0x65e   : > { %v2600_v57 = vadd.f32 %v2599_v56, %v2598_v40 }
 0x662   : > { %v3521_v59 = vpop.f32.mrb[16].mxu0 }
 0x663   : > { %v2608_v62 = vsel %vm1075_vm4, %v3521_v59, 0.0  ;;  %v2520_v45 = vpop.f32.mrb[17].mxu0 }
 0x664   : > { %v2609_v8 = vadd.f32 %v2608_v62, %v2607_v52  ;;  %v2594_v61 = vsel %vm1068_vm3, %v2520_v45, 0.0  ;;  %v3522_v54 = vpop.f32.mrb[18].mxu0  ;;  %v3633_v52 = vld [vmem:[%s4003_s14] sm:$0xff]  }
 0x665   : > { %v2595_v10 = vadd.f32 %v2594_v61, %v2593_v20  ;;  %v2523_v9 = vpop.f32.mrb[19].mxu0  ;;  %3547 = vmatprep.subr.bf16.mxu1 %v3633_v52 }
 0x666   : > { %v2601_v53 = vsel %vm1068_vm3, %v2523_v9, 0.0  ;;  %3548 = vmatpush3.bf16.msra.mxu1 %v3633_v52 }
 0x667   : > { %v2602_v12 = vadd.f32 %v2601_v53, %v2600_v57 }
 0x66a   : > { %v3529_v17 = vpop.f32.mrb[20].mxu0 }
 0x66b   : > { %v2610_v0 = vsel %vm1075_vm4, %v3529_v17, 0.0  ;;  %v2577_v18 = vpop.f32.mrb[21].mxu0 }
 0x66c   : > { %v2611_v1 = vadd.f32 %v2610_v0, %v2609_v8  ;;  %v2596_v44 = vsel %vm1068_vm3, %v2577_v18, 0.0  ;;  %v3530_v60 = vpop.f32.mrb[22].mxu0  ;;  %v3356_v8 = vld [vmem:[%s4647_s3] ss:$0 sm:$0xff] }
 0x66d   : > { %v2597_v5 = vadd.f32 %v2596_v44, %v2595_v10  ;;  %v2580_v21 = vpop.f32.mrb[23].mxu0 }
 0x66e   : > { %v2603_v55 = vsel %vm1068_vm3, %v2580_v21, 0.0  ;;  %v2613_v15 = vpack.c.bf16 %v2611_v1, %v2611_v1 }
 0x66f   : > { %v2604_v24 = vadd.f32 %v2603_v55, %v2602_v12  ;;  %v3357_v12 = vld [vmem:[%s4648_s4] ss:$0 sm:$0xff]  ;;  %v3634_v55 = vld [vmem:[%s4003_s14 + $0x8] sm:$0xff]  }
 0x670   : > { %3549 = vmatprep.subr.bf16.mxu1 %v3634_v55 }
 0x671   : > { %v2612_v63 = vpack.c.bf16 %v2604_v24, %v2597_v5  ;;  %3550 = vmatpush3.bf16.msra.mxu1 %v3634_v55  ;;  %v3635_v24 = vld [vmem:[%s4003_s14 + $0x10] sm:$0xff]  }
 0x672   : > { %3551 = vmatprep.subr.bf16.mxu1 %v3635_v24 }
 0x673   : > { %3535 = vmatprep.mubr.msk.bf16.mxu0 %vm1068_vm3, %v2612_v63  ;;  %v3636_v63 = vld [vmem:[%s4003_s14 + $0x18] sm:$0xff]  }
 0x674   : > { %3536 = vmatmul.mubr.msk.bf16.vlgmr.msra.gmra.mrb[24].mxu0 %vm1068_vm3, %v2613_v15  ;;  %v3637_v15 = vld [vmem:[%s4003_s14 + $0x20] sm:$0xff]  }
 0x675   : > { %3540 = vmatpush3.bf16.msra.mxu0 %v3631_v7  ;;  %3552 = vmatpush3.bf16.msra.mxu1 %v3635_v24 }
 0x676   : > { %3541 = vmatprep.subr.bf16.mxu0 %v3632_v41  ;;  %3553 = vmatprep.subr.bf16.mxu1 %v3636_v63 }
 0x679   : > { %3542 = vmatpush3.bf16.msra.mxu0 %v3632_v41  ;;  %3554 = vmatpush3.bf16.msra.mxu1 %v3636_v63 }
 0x67a   : > { %3555 = vmatprep.subr.bf16.mxu1 %v3637_v15 }
 0x67d   : > { %3556 = vmatpush3.bf16.msra.mxu1 %v3637_v15 }
 0x747   : > { %v3537_v3 = vpop.f32.mrb[24].mxu0 }
 0x748   : > { %v2670_v29 = vpop.f32.mrb[25].mxu0  ;;  %v2686_v14 = vadd.f32 %v3723_v28, %v3537_v3  ;;  %v3638_v3 = vld [vmem:[%s4003_s14 + $0x28] sm:$0xff]   ;;  %v3358_v28 = vld [vmem:[%s4649_s23] ss:$0 sm:$0xff] }
 0x749   : > { %v2684_v25 = vadd.f32 %v3724_v2, %v2670_v29  ;;  %v3538_v27 = vpop.f32.mrb[26].mxu0  ;;  %3557 = vmatprep.subr.bf16.mxu1 %v3638_v3  ;;  %v3640_v29 = vld [vmem:[%s4003_s14 + $0x38] sm:$0xff]  }
 0x74a   : > { %v2673_v39 = vpop.f32.mrb[27].mxu0  ;;  %v4472_v30 = vadd.f32 %v3355_v22, %v2686_v14  ;;  %3558 = vmatpush3.bf16.msra.mxu1 %v3638_v3 }
 0x74b   : > { %v4470_v11 = vadd.f32 %v3355_v22, %v2684_v25  ;;  %v2685_v4 = vadd.f32 %v3725_v16, %v2673_v39 }
 0x74c   : > { %v2705_v34 = vsel %vm1075_vm4, %v4472_v30, 0.0 }
 0x74d   : > { %v4474_v31 = vadd.f32 %v3355_v22, %v2685_v4  ;;  %v2699_v32 = vsel %vm1068_vm3, %v4470_v11, 0.0  ;;  %v3639_v22 = vld [vmem:[%s4003_s14 + $0x30] sm:$0xff]  }
 0x74e   : > { %2700 = vadd.xlane.f32.xlu0 %v2699_v32  ;;  %3559 = vmatprep.subr.bf16.mxu1 %v3639_v22 }
 0x74f   : > { %v2702_v37 = vsel %vm1068_vm3, %v4474_v31, 0.0  ;;  %3560 = vmatpush3.bf16.msra.mxu1 %v3639_v22 }
 0x750   : > { %2703 = vadd.xlane.f32.xlu1 %v2702_v37  ;;  %3561 = vmatprep.subr.bf16.mxu1 %v3640_v29 }
 0x752   : > { %2706 = vadd.xlane.f32.xlu0 %v2705_v34 }
 0x753   : > { %3562 = vmatpush3.bf16.msra.mxu1 %v3640_v29 }
 0x7db   : > { %v2701_v49 = vpop.xlane.xlu0 %2700 }
 0x7dc   : > { %v2708_v50 = vmul.f32 0.03125, %v2701_v49 }
 0x7dd   : > { %v2704_v36 = vpop.xlane.xlu1 %2703 }
 0x7de   : > { %v2711_v19 = vsub.f32 %v4470_v11, %v2708_v50  ;;  %v2709_v23 = vmul.f32 0.03125, %v2704_v36 }
 0x7df   : > { %v2707_v13 = vpop.xlane.xlu0 %2706 }
 0x7e0   : > { %v2712_v6 = vsub.f32 %v4474_v31, %v2709_v23  ;;  %v2710_v35 = vmul.f32 0.03125, %v2707_v13  ;;  %v2714_v51 = vmul.f32 %v2711_v19, %v2711_v19 }
 0x7e2   : > { %v2713_v48 = vsub.f32 %v4472_v30, %v2710_v35  ;;  %v2717_v26 = vsel %vm1068_vm3, %v2714_v51, 0.0  ;;  %v2715_v33 = vmul.f32 %v2712_v6, %v2712_v6 }
 0x7e3   : > { %2718 = vadd.xlane.f32.xlu1 %v2717_v26 }
 0x7e4   : > { %v2720_v58 = vsel %vm1068_vm3, %v2715_v33, 0.0  ;;  %v2716_v38 = vmul.f32 %v2713_v48, %v2713_v48 }
 0x7e5   : > { %2721 = vadd.xlane.f32.xlu0 %v2720_v58 }
 0x7e6   : > { %v2723_v43 = vsel %vm1075_vm4, %v2716_v38, 0.0 }
 0x7e7   : > { %2724 = vadd.xlane.f32.xlu1 %v2723_v43 }
 0x870   : > { %v2719_v42 = vpop.xlane.xlu1 %2718 }
 0x871   : > { %v2726_v46 = vmul.f32 0.03125, %v2719_v42 }
 0x872   : > { %v2722_v20 = vpop.xlane.xlu0 %2721 }
 0x873   : > { %v2729_v47 = vadd.f32 1e-06, %v2726_v46  ;;  %v2727_v40 = vmul.f32 0.03125, %v2722_v20 }
 0x874   : > { %v2725_v56 = vpop.xlane.xlu1 %2724 }
 0x875   : > { %3711 = vrsqrt.f32 %v2729_v47  ;;  %v2730_v57 = vadd.f32 1e-06, %v2727_v40  ;;  %v2728_v59 = vmul.f32 0.03125, %v2725_v56 }
 0x877   : > { %3713 = vrsqrt.f32 %v2730_v57  ;;  %v2731_v62 = vadd.f32 1e-06, %v2728_v59 }
 0x879   : > { %3715 = vrsqrt.f32 %v2731_v62 }
 0x87f   : > { %v3712_v45 = vpop.eup %3711 }
 0x880   : > { %v2735_v61 = vmul.f32 %v3712_v45, %v2711_v19  ;;  %v3371_v45 = vld [vmem:[%s950_s13] ss:$0 sm:$0xff] }
 0x881   : > { %v3714_v54 = vpop.eup %3713 }
 0x882   : > { %v2736_v10 = vmul.f32 %v3714_v54, %v2712_v6  ;;  %v2744_v9 = vmul.f32 %v3356_v8, %v2735_v61 }
 0x883   : > { %v3716_v53 = vpop.eup %3715 }
 0x884   : > { %v2737_v17 = vmul.f32 %v3716_v53, %v2713_v48  ;;  %v2745_v0 = vmul.f32 %v3356_v8, %v2736_v10  ;;  %v2753_v1 = vadd.f32 %v3357_v12, %v2744_v9 }
 0x886   : > { %v2746_v18 = vmul.f32 %v3356_v8, %v2737_v17  ;;  %v2754_v44 = vadd.f32 %v3357_v12, %v2745_v0 }
 0x888   : > { %v2756_v60 = vpack.c.bf16 %v2754_v44, %v2753_v1  ;;  %v2755_v5 = vadd.f32 %v3357_v12, %v2746_v18 }
 0x88a   : > { %3543 = vmatprep.mubr.msk.bf16.mxu0 %vm1068_vm3, %v2756_v60  ;;  %v2757_v21 = vpack.c.bf16 %v2755_v5, %v2755_v5 }
 0x88c   : > { %3544 = vmatmul.mubr.msk.bf16.vlgmr.msra.gmra.mrb[28].mxu0 %vm1068_vm3, %v2757_v21 }
 0x95f   : > { %v3545_v14 = vpop.f32.mrb[28].mxu0 }
 0x960   : > { %v2830_v2 = vadd.f32 %v3545_v14, %v3358_v28  ;;  %v2821_v25 = vpop.f32.mrb[29].mxu0 }
 0x961   : > { %v2822_v27 = vadd.f32 %v3358_v28, %v2821_v25  ;;  %v3546_v39 = vpop.f32.mrb[30].mxu0 }
 0x962   : > { %v2837_v16 = vmul.f32 %v2830_v2, %v2830_v2  ;;  %v2824_v4 = vpop.f32.mrb[31].mxu0 }
 0x963   : > { %v2835_v32 = vmul.f32 %v2822_v27, %v2822_v27  ;;  %v2825_v37 = vadd.f32 %v3358_v28, %v2824_v4 }
 0x964   : > { %v2840_v34 = vmul.f32 %v2837_v16, %v2830_v2 }
 0x965   : > { %v2838_v49 = vmul.f32 %v2835_v32, %v2822_v27  ;;  %v2836_v50 = vmul.f32 %v2825_v37, %v2825_v37 }
 0x966   : > { %v2843_v36 = vmul.f32 0.044715, %v2840_v34 }
 0x967   : > { %v2841_v19 = vmul.f32 0.044715, %v2838_v49  ;;  %v2839_v23 = vmul.f32 %v2836_v50, %v2825_v37  ;;  %v3373_v50 = vld [vmem:[%s4652_s6] ss:$0 sm:$0xff] (!%p3372_p8) }
 0x968   : > { %v2846_v13 = vadd.f32 %v2843_v36, %v2830_v2 }
 0x969   : > { %v2844_v6 = vadd.f32 %v2841_v19, %v2822_v27  ;;  %v2842_v35 = vmul.f32 0.044715, %v2839_v23  ;;  %v3374_v19 = vld [vmem:[%s4653_s25] ss:$0 sm:$0xff] (!%p3372_p8) }
 0x96a   : > { %v2849_v51 = vmul.f32 0.7978846, %v2846_v13 }
 0x96b   : > { %v2847_v48 = vmul.f32 0.7978846, %v2844_v6  ;;  %v2845_v26 = vadd.f32 %v2842_v35, %v2825_v37 }
 0x96c   : > { %3717 = vtanh.f32 %v2849_v51 }
 0x96d   : > { %3719 = vtanh.f32 %v2847_v48  ;;  %v2848_v33 = vmul.f32 0.7978846, %v2845_v26 }
 0x96f   : > { %3721 = vtanh.f32 %v2848_v33 }
 0x976   : > { %v3718_v58 = vpop.eup %3717 }
 0x977   : > { %v3720_v38 = vpop.eup %3719  ;;  %v2855_v43 = vadd.f32 1.0, %v3718_v58 }
 0x978   : > { %v2853_v7 = vadd.f32 1.0, %v3720_v38 }
 0x979   : > { %v3722_v41 = vpop.eup %3721  ;;  %v2858_v52 = vmul.f32 0.5, %v2855_v43 }
 0x97a   : > { %v2854_v42 = vadd.f32 1.0, %v3722_v41  ;;  %v2856_v46 = vmul.f32 0.5, %v2853_v7 }
 0x97b   : > { %v2861_v47 = vmul.f32 %v2858_v52, %v2830_v2 }
 0x97c   : > { %v2857_v20 = vmul.f32 0.5, %v2854_v42  ;;  %v2859_v40 = vmul.f32 %v2856_v46, %v2822_v27 }
 0x97d   : > { %v2863_v59 = vpack.c.bf16 %v2861_v47, %v2861_v47 }
 0x97e   : > { %v2860_v56 = vmul.f32 %v2857_v20, %v2825_v37 }
 0x980   : > { %v2862_v57 = vpack.c.bf16 %v2860_v56, %v2859_v40 }
 0x982   : > { %3563 = vmatprep.mubr.bf16.mxu1 %v2862_v57 }
 0x983   : > { %3564 = vmatmul.mubr.bf16.vlgmr.msra.gmra.mrb[24].mxu1 %v2863_v59 }
 0xa56   : > { %v3565_v62 = vpop.f32.mrb[24].mxu1 }
 0xa57   : > { %v2978_v8 = vadd.f32 %v3565_v62, %v4472_v30  ;;  %v2962_v61 = vpop.f32.mrb[25].mxu1 }
 0xa58   : > { %v2976_v54 = vadd.f32 %v2962_v61, %v4470_v11  ;;  %v3566_v10 = vpop.f32.mrb[26].mxu1  ;;  %2995 = sbr.rel (%p3372_p8) target bundleno = 2971 (0xb9b), region = 116 }
 0xa59   : > { %v2988_v9 = vadd.f32 %v3371_v45, %v2978_v8  ;;  %v2965_v53 = vpop.f32.mrb[27].mxu1 }
 0xa5a   : > { %v2986_v12 = vadd.f32 %v3371_v45, %v2976_v54  ;;  %v2977_v17 = vadd.f32 %v2965_v53, %v4474_v31 }
 0xa5b   : > { %2991 = vst.msk [vmem:[#allocation2 + $0x10] sm:$0xf] %vm1075_vm4, %v2988_v9  ;;  %v3004_v11 = vsel (!%p3372_p8), %vm1075_vm4, %v2988_v9, 0.0 }
 0xa5c   : > { %2989 = vst.msk [vmem:[#allocation2] sm:$0xff] %vm1068_vm3, %v2986_v12  ;;  %v2987_v0 = vadd.f32 %v3371_v45, %v2977_v17  ;;  %v2998_v30 = vsel (!%p3372_p8), %vm1068_vm3, %v2986_v12, 0.0  ;;  %3005 = vadd.xlane.f32.xlu1 (!%p3372_p8), %v3004_v11 }
 0xa5d   : > { %2999 = vadd.xlane.f32.xlu0 (!%p3372_p8), %v2998_v30 }
 0xa5e   : > { %2990 = vst.msk [vmem:[#allocation2 + $0x8] sm:$0xff] %vm1068_vm3, %v2987_v0  ;;  %v3001_v18 = vsel (!%p3372_p8), %vm1068_vm3, %v2987_v0, 0.0 }
 0xa61   : > { %3002 = vadd.xlane.f32.xlu0 %v3001_v18 }
 0xae9   : > { %v3006_v1 = vpop.xlane.xlu1 %3005 }
 0xaea   : > { %v3000_v31 = vpop.xlane.xlu0 %2999  ;;  %v3009_v60 = vmul.f32 0.03125, %v3006_v1 }
 0xaeb   : > { %v3007_v44 = vmul.f32 0.03125, %v3000_v31 }
 0xaec   : > { %v3012_v21 = vsub.f32 %v2988_v9, %v3009_v60 }
 0xaed   : > { %v3010_v5 = vsub.f32 %v2986_v12, %v3007_v44 }
 0xaee   : > { %v3003_v55 = vpop.xlane.xlu0 %3002  ;;  %v3015_v15 = vmul.f32 %v3012_v21, %v3012_v21 }
 0xaef   : > { %v3008_v24 = vmul.f32 0.03125, %v3003_v55  ;;  %v3013_v63 = vmul.f32 %v3010_v5, %v3010_v5 }
 0xaf0   : > { %v3022_v29 = vsel %vm1075_vm4, %v3015_v15, 0.0 }
 0xaf1   : > { %v3011_v3 = vsub.f32 %v2987_v0, %v3008_v24  ;;  %v3016_v22 = vsel %vm1068_vm3, %v3013_v63, 0.0 }
 0xaf2   : > { %3017 = vadd.xlane.f32.xlu1 %v3016_v22 }
 0xaf3   : > { %v3014_v28 = vmul.f32 %v3011_v3, %v3011_v3 }
 0xaf5   : > { %v3019_v14 = vsel %vm1068_vm3, %v3014_v28, 0.0 }
 0xaf6   : > { %3023 = vadd.xlane.f32.xlu1 %v3022_v29  ;;  %3020 = vadd.xlane.f32.xlu0 %v3019_v14 }
 0xb7f   : > { %v3018_v2 = vpop.xlane.xlu1 %3017 }
 0xb80   : > { %v3025_v25 = vmul.f32 0.03125, %v3018_v2 }
 0xb82   : > { %v3028_v27 = vadd.f32 1e-06, %v3025_v25 }
 0xb83   : > { %v3024_v39 = vpop.xlane.xlu1 %3023  ;;  %v3021_v16 = vpop.xlane.xlu0 %3020 }
 0xb84   : > { %3726 = vrsqrt.f32 %v3028_v27  ;;  %v3027_v4 = vmul.f32 0.03125, %v3024_v39  ;;  %v3026_v32 = vmul.f32 0.03125, %v3021_v16 }
 0xb86   : > { %v3030_v37 = vadd.f32 1e-06, %v3027_v4  ;;  %v3029_v34 = vadd.f32 1e-06, %v3026_v32 }
 0xb88   : > { %3728 = vrsqrt.f32 %v3030_v37 }
 0xb89   : > { %3730 = vrsqrt.f32 %v3029_v34 }
 0xb8e   : > { %v3727_v49 = vpop.eup %3726 }
 0xb8f   : > { %v3034_v36 = vmul.f32 %v3727_v49, %v3010_v5 }
 0xb91   : > { %v3043_v23 = vmul.f32 %v3373_v50, %v3034_v36 }
 0xb92   : > { %v3729_v13 = vpop.eup %3728 }
 0xb93   : > { %v3731_v6 = vpop.eup %3730  ;;  %v3052_v35 = vadd.f32 %v3374_v19, %v3043_v23  ;;  %v3036_v51 = vmul.f32 %v3729_v13, %v3012_v21 }
 0xb94   : > { %v3035_v48 = vmul.f32 %v3731_v6, %v3011_v3 }
 0xb95   : > { %3055 = vst.msk [vmem:[%s4008_s20] sm:$0xff] %vm1068_vm3, %v3052_v35  ;;  %v3045_v26 = vmul.f32 %v3373_v50, %v3036_v51 }
 0xb96   : > { %v3044_v33 = vmul.f32 %v3373_v50, %v3035_v48 }
 0xb97   : > { %v3054_v58 = vadd.f32 %v3374_v19, %v3045_v26 }
 0xb98   : > { %v3053_v38 = vadd.f32 %v3374_v19, %v3044_v33 }
 0xb99   : > { %3057 = vst.msk [vmem:[%s4008_s20 + $0x10] sm:$0xf] %vm1075_vm4, %v3054_v58 }
 0xb9a   : > { %3056 = vst.msk [vmem:[%s4008_s20 + $0x8] sm:$0xff] %vm1068_vm3, %v3053_v38 }
 0xb9b PF: > { %s4654_s26 = sld [smem:[#allocation6_spill]]  ;;  %s4655_s3 = sld [smem:[#allocation4_spill]] }
 0xb9c   : > { %s4656_s28 = sld [smem:[#allocation5_spill]]  ;;  %s4657_s29 = sld [smem:[#allocation7_spill]] }
 0xb9d   : > { %s4658_s30 = sld [smem:[#allocation8_spill]] }
 0xba1   : > { %s32_s4 = sadd.s32 1, %s4654_s26  }
 0xba2   : > { %p29_p9 = scmp.ge.s32.totalorder %s32_s4, 6  }
 0xba4   :  { %31 = sbr.rel (!%p29_p9) target bundleno = 20 (0x14), region = 194 }

</bundles_post_ra>
